<compile_context>
chip_gen: v7x
topology: tpu7x:2x2x1
jax: 0.10.0
libtpu: 0.0.40
codegen_flags: <defaults>
</compile_context>

<pallas_src>
import functools

import jax
import jax.numpy as jnp
from jax.experimental import pallas as pl
from jax.experimental.pallas import tpu as pltpu


def _aug_kernel(dy_ref, dx_ref, br_ref, ct_ref, img_ref, out_ref,
                *, C, H, W, pad, bt, B):
    b0 = pl.program_id(0)

    # Hoisted row/col index maps for the zero-fill mask (loop-invariant, cheap VPU).
    row = jax.lax.broadcasted_iota(jnp.int32, (H, W), 0)
    col = jax.lax.broadcasted_iota(jnp.int32, (H, W), 1)

    def body(s, carry):
        # Global sample index; clamp so the ragged tail never reads OOB SMEM.
        i = jnp.minimum(b0 * bt + s, B - 1)
        dy = jnp.clip(dy_ref[i], 0, 2 * pad)   # guard against out-of-range offsets
        dx = jnp.clip(dx_ref[i], 0, 2 * pad)
        br = br_ref[i]
        ct = ct_ref[i]

        # Grayscale mean of the raw image; brightness factors out of the mean
        # linearly, so the whole color aug folds into one affine per pixel:
        #   clip((x*br - br*mean_x)*ct + br*mean_x, 0, 1) == clip(x*a + b, 0, 1)
        gray = (0.299 * img_ref[s, 0, :, :].astype(jnp.float32)
                + 0.587 * img_ref[s, 1, :, :].astype(jnp.float32)
                + 0.114 * img_ref[s, 2, :, :].astype(jnp.float32))
        mean = jnp.mean(gray)
        a_s = br * ct
        b_s = br * mean * (1.0 - ct)

        # Translation aug (pad + random crop == shift with zero fill):
        #   out[r, c] = y[r + sy, c + sx] if both in range else 0
        sy = dy - pad
        sx = dx - pad
        valid = jnp.logical_and(
            (row + sy).astype(jnp.uint32) < jnp.uint32(H),   # single unsigned cmp / axis
            (col + sx).astype(jnp.uint32) < jnp.uint32(W),
        )
        rshift = (pad - dy) % H   # non-negative sublane rotate amount (== -sy mod H)
        cshift = (pad - dx) % W   # non-negative lane rotate amount    (== -sx mod W)

        # Stream per channel: at most one (H, W) f32 plane live -> low vreg pressure.
        for c in range(C):
            y = jnp.clip(img_ref[s, c, :, :].astype(jnp.float32) * a_s + b_s, 0.0, 1.0)
            y = pltpu.roll(y, rshift, 0)     # row shift: XLU sublane rotate (free slot)
            y = pltpu.roll(y, cshift, 1)     # col shift: XLU lane rotate    (free slot)
            out_ref[s, c, :, :] = jnp.where(valid, y, 0.0).astype(out_ref.dtype)
        return carry

    jax.lax.fori_loop(0, bt, body, 0, unroll=(2 if bt >= 2 else 1))


def _pick_block_batch(B, C, H, W, in_isz, out_isz, budget_bytes=16 * 1024 * 1024):
    """Samples per grid step: fit double-buffered in+out blocks in the VMEM budget,
    capped so the grid has >= 2 steps (both v7x TensorCores get work)."""
    per_sample = 2 * C * H * W * (in_isz + out_isz)   # x2: double buffering
    bt = max(1, budget_bytes // max(per_sample, 1))
    if B >= 2:
        bt = min(bt, (B + 1) // 2)                    # guarantee >= 2 grid iterations
    return int(min(bt, B))


def img_aug_pallas(images, dy, dx, brightness, contrast, pad):
    """images: (B, C, H, W) float in [0, 1]. Returns color-jittered + shifted images."""
    B, C, H, W = images.shape
    assert C == 3, "grayscale-mean contrast assumes RGB (C == 3) input"
    assert H > 2 * pad and W > 2 * pad, "translation pad too large for the image"

    in_isz = jnp.dtype(images.dtype).itemsize
    out_isz = in_isz
    bt = _pick_block_batch(B, C, H, W, in_isz, out_isz)
    kernel = functools.partial(_aug_kernel, C=C, H=H, W=W, pad=pad, bt=bt, B=B)

    # Double-buffered in + out blocks plus headroom for in-kernel f32 temporaries.
    block_bytes = 2 * bt * C * H * W * (in_isz + out_isz)
    vmem_limit = int(min(block_bytes + (8 << 20), 48 << 20))

    grid_spec = pltpu.PrefetchScalarGridSpec(
        num_scalar_prefetch=4,                    # dy, dx, brightness, contrast -> SMEM
        grid=(pl.cdiv(B, bt),),                   # ragged tail handled via clamped index
        in_specs=[pl.BlockSpec((bt, C, H, W), lambda b, *_: (b, 0, 0, 0))],
        out_specs=pl.BlockSpec((bt, C, H, W), lambda b, *_: (b, 0, 0, 0)),
    )

    return pl.pallas_call(
        kernel,
        out_shape=jax.ShapeDtypeStruct((B, C, H, W), images.dtype),
        grid_spec=grid_spec,
        compiler_params=pltpu.CompilerParams(
            dimension_semantics=("parallel",),    # shard batch blocks across TCs (v7x)
            vmem_limit_bytes=vmem_limit),
    )(dy.astype(jnp.int32), dx.astype(jnp.int32),
      brightness.astype(jnp.float32), contrast.astype(jnp.float32), images)


def img_aug_ref(images, dy, dx, brightness, contrast, pad):
    """Pure-JAX reference: color jitter, then pad+crop (zero-fill shift)."""
    B, C, H, W = images.shape

    def one(img, dyi, dxi, br, ct):
        x = img.astype(jnp.float32)
        xb = x * br
        gray = 0.299 * xb[0] + 0.587 * xb[1] + 0.114 * xb[2]
        m = jnp.mean(gray)
        y = jnp.clip((xb - m) * ct + m, 0.0, 1.0)
        ypad = jnp.pad(y, ((0, 0), (pad, pad), (pad, pad)))
        out = jax.lax.dynamic_slice(ypad, (jnp.int32(0), dyi, dxi), (C, H, W))
        return out.astype(images.dtype)

    return jax.vmap(one)(images, dy, dx, brightness, contrast)


if __name__ == "__main__":
    key = jax.random.PRNGKey(0)
    k_img, k_dy, k_dx, k_br, k_ct = jax.random.split(key, 5)

    B, C, H, W = 2, 3, 128, 128   # LIBERO RGB observations are 128x128 (lane-dense W)
    pad = 4                       # translation_aug padding

    images = jax.random.uniform(k_img, (B, C, H, W), dtype=jnp.float32)
    dy = jax.random.randint(k_dy, (B,), 0, 2 * pad + 1, dtype=jnp.int32)
    dx = jax.random.randint(k_dx, (B,), 0, 2 * pad + 1, dtype=jnp.int32)
    brightness = jax.random.uniform(k_br, (B,), jnp.float32, 0.9, 1.1)
    contrast = jax.random.uniform(k_ct, (B,), jnp.float32, 0.9, 1.1)

    out = img_aug_pallas(images, dy, dx, brightness, contrast, pad)
    out = jax.block_until_ready(out)

    ref = img_aug_ref(images, dy, dx, brightness, contrast, pad)
    assert out.shape == (B, C, H, W)
    assert jnp.allclose(out, ref, atol=1e-5, rtol=1e-5), "mismatch vs JAX reference"

    print("KERNEL_OK")
</pallas_src>

<mosaic_0001>
module attributes {stable_mosaic.version = 11 : i64} {
  func.func @_aug_kernel(%arg0: i32, %arg1: memref<2xi32, #tpu.memory_space<smem>>, %arg2: memref<2xi32, #tpu.memory_space<smem>>, %arg3: memref<2xf32, #tpu.memory_space<smem>>, %arg4: memref<2xf32, #tpu.memory_space<smem>>, %arg5: memref<1x3x128x128xf32, #tpu.memory_space<vmem>>, %arg6: memref<1x3x128x128xf32, #tpu.memory_space<vmem>>) attributes {dimension_semantics = [#tpu.dimension_semantics<parallel>], iteration_bounds = array<i64: 2>, scalar_prefetch = 4 : i64, scratch_operands = 0 : i64, tpu.core_type = #tpu.core_type<tc>, window_params = [{transform_indices = @transform_0, window_bounds = array<i64: 1, 3, 128, 128>}, {transform_indices = @transform_1, window_bounds = array<i64: 1, 3, 128, 128>}]} {
    %0 = tpu.iota {dimensions = array<i32: 0>} : vector<128x128xi32>
    %1 = tpu.iota {dimensions = array<i32: 1>} : vector<128x128xi32>
    %c0_i32 = arith.constant 0 : i32
    %c1_i32 = arith.constant 1 : i32
    %2 = arith.muli %arg0, %c1_i32 : i32
    %3 = arith.addi %2, %c0_i32 : i32
    %c1_i32_0 = arith.constant 1 : i32
    %4 = arith.minsi %3, %c1_i32_0 : i32
    %5 = arith.index_cast %4 : i32 to index
    %6 = memref.load %arg1[%5] : memref<2xi32, #tpu.memory_space<smem>>
    %c0_i32_1 = arith.constant 0 : i32
    %c8_i32 = arith.constant 8 : i32
    %7 = arith.maxsi %c0_i32_1, %6 : i32
    %8 = arith.minsi %c8_i32, %7 : i32
    %9 = arith.index_cast %4 : i32 to index
    %10 = memref.load %arg2[%9] : memref<2xi32, #tpu.memory_space<smem>>
    %c0_i32_2 = arith.constant 0 : i32
    %c8_i32_3 = arith.constant 8 : i32
    %11 = arith.maxsi %c0_i32_2, %10 : i32
    %12 = arith.minsi %c8_i32_3, %11 : i32
    %13 = arith.index_cast %4 : i32 to index
    %14 = memref.load %arg3[%13] : memref<2xf32, #tpu.memory_space<smem>>
    %15 = arith.index_cast %4 : i32 to index
    %16 = memref.load %arg4[%15] : memref<2xf32, #tpu.memory_space<smem>>
    %17 = arith.index_cast %c0_i32 : i32 to index
    %c0 = arith.constant 0 : index
    %c0_4 = arith.constant 0 : index
    %c0_5 = arith.constant 0 : index
    %18 = vector.load %arg5[%17, %c0, %c0_4, %c0_5] : memref<1x3x128x128xf32, #tpu.memory_space<vmem>>, vector<1x1x128x128xf32>
    %19 = vector.shape_cast %18 : vector<1x1x128x128xf32> to vector<128x128xf32>
    %cst = arith.constant 2.990000e-01 : f32
    %20 = vector.broadcast %cst : f32 to vector<128x128xf32>
    %21 = arith.mulf %20, %19 : vector<128x128xf32>
    %22 = arith.index_cast %c0_i32 : i32 to index
    %c1 = arith.constant 1 : index
    %c0_6 = arith.constant 0 : index
    %c0_7 = arith.constant 0 : index
    %23 = vector.load %arg5[%22, %c1, %c0_6, %c0_7] : memref<1x3x128x128xf32, #tpu.memory_space<vmem>>, vector<1x1x128x128xf32>
    %24 = vector.shape_cast %23 : vector<1x1x128x128xf32> to vector<128x128xf32>
    %cst_8 = arith.constant 5.870000e-01 : f32
    %25 = vector.broadcast %cst_8 : f32 to vector<128x128xf32>
    %26 = arith.mulf %25, %24 : vector<128x128xf32>
    %27 = arith.addf %21, %26 : vector<128x128xf32>
    %28 = arith.index_cast %c0_i32 : i32 to index
    %c2 = arith.constant 2 : index
    %c0_9 = arith.constant 0 : index
    %c0_10 = arith.constant 0 : index
    %29 = vector.load %arg5[%28, %c2, %c0_9, %c0_10] : memref<1x3x128x128xf32, #tpu.memory_space<vmem>>, vector<1x1x128x128xf32>
    %30 = vector.shape_cast %29 : vector<1x1x128x128xf32> to vector<128x128xf32>
    %cst_11 = arith.constant 1.140000e-01 : f32
    %31 = vector.broadcast %cst_11 : f32 to vector<128x128xf32>
    %32 = arith.mulf %31, %30 : vector<128x128xf32>
    %33 = arith.addf %27, %32 : vector<128x128xf32>
    %34 = vector.shape_cast %33 : vector<128x128xf32> to vector<1x128x128xf32>
    %cst_12 = arith.constant dense<0.000000e+00> : vector<1xf32>
    %35 = vector.multi_reduction <add>, %34, %cst_12 [1, 2] : vector<1x128x128xf32> to vector<1xf32>
    %36 = vector.shape_cast %35 : vector<1xf32> to vector<1x1x1xf32>
    %37 = vector.extract %36[0, 0, 0] : f32 from vector<1x1x1xf32>
    %cst_13 = arith.constant 1.638400e+04 : f32
    %38 = arith.divf %37, %cst_13 : f32
    %39 = arith.mulf %14, %16 : f32
    %40 = arith.mulf %14, %38 : f32
    %cst_14 = arith.constant 1.000000e+00 : f32
    %41 = arith.subf %cst_14, %16 : f32
    %42 = arith.mulf %40, %41 : f32
    %c4_i32 = arith.constant 4 : i32
    %43 = arith.subi %8, %c4_i32 : i32
    %c4_i32_15 = arith.constant 4 : i32
    %44 = arith.subi %12, %c4_i32_15 : i32
    %45 = vector.broadcast %43 : i32 to vector<128x128xi32>
    %46 = arith.addi %0, %45 : vector<128x128xi32>
    %c128_i32 = arith.constant 128 : i32
    %47 = vector.broadcast %c128_i32 : i32 to vector<128x128xi32>
    %48 = arith.cmpi ult, %46, %47 : vector<128x128xi32>
    %49 = vector.broadcast %44 : i32 to vector<128x128xi32>
    %50 = arith.addi %1, %49 : vector<128x128xi32>
    %c128_i32_16 = arith.constant 128 : i32
    %51 = vector.broadcast %c128_i32_16 : i32 to vector<128x128xi32>
    %52 = arith.cmpi ult, %50, %51 : vector<128x128xi32>
    %53 = arith.andi %48, %52 : vector<128x128xi1>
    %c4_i32_17 = arith.constant 4 : i32
    %54 = arith.subi %c4_i32_17, %8 : i32
    %c128_i32_18 = arith.constant 128 : i32
    %c0_i32_19 = arith.constant 0 : i32
    %55 = arith.cmpi eq, %c128_i32_18, %c0_i32_19 : i32
    %c1_i32_20 = arith.constant 1 : i32
    %56 = arith.select %55, %c1_i32_20, %c128_i32_18 : i32
    %57 = arith.remsi %54, %56 : i32
    %c0_i32_21 = arith.constant 0 : i32
    %58 = arith.cmpi ne, %57, %c0_i32_21 : i32
    %c0_i32_22 = arith.constant 0 : i32
    %59 = arith.cmpi slt, %57, %c0_i32_22 : i32
    %c0_i32_23 = arith.constant 0 : i32
    %60 = arith.cmpi slt, %56, %c0_i32_23 : i32
    %61 = arith.xori %59, %60 : i1
    %62 = arith.andi %61, %58 : i1
    %63 = arith.addi %57, %56 : i32
    %64 = arith.select %62, %63, %57 : i32
    %c4_i32_24 = arith.constant 4 : i32
    %65 = arith.subi %c4_i32_24, %12 : i32
    %c128_i32_25 = arith.constant 128 : i32
    %c0_i32_26 = arith.constant 0 : i32
    %66 = arith.cmpi eq, %c128_i32_25, %c0_i32_26 : i32
    %c1_i32_27 = arith.constant 1 : i32
    %67 = arith.select %66, %c1_i32_27, %c128_i32_25 : i32
    %68 = arith.remsi %65, %67 : i32
    %c0_i32_28 = arith.constant 0 : i32
    %69 = arith.cmpi ne, %68, %c0_i32_28 : i32
    %c0_i32_29 = arith.constant 0 : i32
    %70 = arith.cmpi slt, %68, %c0_i32_29 : i32
    %c0_i32_30 = arith.constant 0 : i32
    %71 = arith.cmpi slt, %67, %c0_i32_30 : i32
    %72 = arith.xori %70, %71 : i1
    %73 = arith.andi %72, %69 : i1
    %74 = arith.addi %68, %67 : i32
    %75 = arith.select %73, %74, %68 : i32
    %76 = arith.index_cast %c0_i32 : i32 to index
    %c0_31 = arith.constant 0 : index
    %c0_32 = arith.constant 0 : index
    %c0_33 = arith.constant 0 : index
    %77 = vector.load %arg5[%76, %c0_31, %c0_32, %c0_33] : memref<1x3x128x128xf32, #tpu.memory_space<vmem>>, vector<1x1x128x128xf32>
    %78 = vector.shape_cast %77 : vector<1x1x128x128xf32> to vector<128x128xf32>
    %79 = vector.broadcast %39 : f32 to vector<128x128xf32>
    %80 = arith.mulf %78, %79 : vector<128x128xf32>
    %81 = vector.broadcast %42 : f32 to vector<128x128xf32>
    %82 = arith.addf %80, %81 : vector<128x128xf32>
    %cst_34 = arith.constant 0.000000e+00 : f32
    %cst_35 = arith.constant 1.000000e+00 : f32
    %83 = vector.broadcast %cst_34 : f32 to vector<128x128xf32>
    %84 = arith.maximumf %83, %82 : vector<128x128xf32>
    %85 = vector.broadcast %cst_35 : f32 to vector<128x128xf32>
    %86 = arith.minimumf %85, %84 : vector<128x128xf32>
    %87 = tpu.dynamic_rotate %86 by %64 dim 0 : vector<128x128xf32>, i32 -> vector<128x128xf32>
    %88 = tpu.dynamic_rotate %87 by %75 dim 1 : vector<128x128xf32>, i32 -> vector<128x128xf32>
    %cst_36 = arith.constant 0.000000e+00 : f32
    %89 = vector.broadcast %cst_36 : f32 to vector<128x128xf32>
    %90 = arith.select %53, %88, %89 : vector<128x128xi1>, vector<128x128xf32>
    %91 = arith.index_cast %c0_i32 : i32 to index
    %c0_37 = arith.constant 0 : index
    %c0_38 = arith.constant 0 : index
    %c0_39 = arith.constant 0 : index
    %92 = vector.load %arg6[%91, %c0_37, %c0_38, %c0_39] : memref<1x3x128x128xf32, #tpu.memory_space<vmem>>, vector<1x1x128x128xf32>
    %93 = vector.shape_cast %92 : vector<1x1x128x128xf32> to vector<128x128xf32>
    %94 = vector.shape_cast %90 : vector<128x128xf32> to vector<1x1x128x128xf32>
    tpu.vector_store %arg6[%91, %c0_37, %c0_38, %c0_39], %94 {strides = array<i32>} : memref<1x3x128x128xf32, #tpu.memory_space<vmem>>, vector<1x1x128x128xf32>,
    %95 = arith.index_cast %c0_i32 : i32 to index
    %c1_40 = arith.constant 1 : index
    %c0_41 = arith.constant 0 : index
    %c0_42 = arith.constant 0 : index
    %96 = vector.load %arg5[%95, %c1_40, %c0_41, %c0_42] : memref<1x3x128x128xf32, #tpu.memory_space<vmem>>, vector<1x1x128x128xf32>
    %97 = vector.shape_cast %96 : vector<1x1x128x128xf32> to vector<128x128xf32>
    %98 = vector.broadcast %39 : f32 to vector<128x128xf32>
    %99 = arith.mulf %97, %98 : vector<128x128xf32>
    %100 = vector.broadcast %42 : f32 to vector<128x128xf32>
    %101 = arith.addf %99, %100 : vector<128x128xf32>
    %cst_43 = arith.constant 0.000000e+00 : f32
    %cst_44 = arith.constant 1.000000e+00 : f32
    %102 = vector.broadcast %cst_43 : f32 to vector<128x128xf32>
    %103 = arith.maximumf %102, %101 : vector<128x128xf32>
    %104 = vector.broadcast %cst_44 : f32 to vector<128x128xf32>
    %105 = arith.minimumf %104, %103 : vector<128x128xf32>
    %106 = tpu.dynamic_rotate %105 by %64 dim 0 : vector<128x128xf32>, i32 -> vector<128x128xf32>
    %107 = tpu.dynamic_rotate %106 by %75 dim 1 : vector<128x128xf32>, i32 -> vector<128x128xf32>
    %cst_45 = arith.constant 0.000000e+00 : f32
    %108 = vector.broadcast %cst_45 : f32 to vector<128x128xf32>
    %109 = arith.select %53, %107, %108 : vector<128x128xi1>, vector<128x128xf32>
    %110 = arith.index_cast %c0_i32 : i32 to index
    %c1_46 = arith.constant 1 : index
    %c0_47 = arith.constant 0 : index
    %c0_48 = arith.constant 0 : index
    %111 = vector.load %arg6[%110, %c1_46, %c0_47, %c0_48] : memref<1x3x128x128xf32, #tpu.memory_space<vmem>>, vector<1x1x128x128xf32>
    %112 = vector.shape_cast %111 : vector<1x1x128x128xf32> to vector<128x128xf32>
    %113 = vector.shape_cast %109 : vector<128x128xf32> to vector<1x1x128x128xf32>
    tpu.vector_store %arg6[%110, %c1_46, %c0_47, %c0_48], %113 {strides = array<i32>} : memref<1x3x128x128xf32, #tpu.memory_space<vmem>>, vector<1x1x128x128xf32>,
    %114 = arith.index_cast %c0_i32 : i32 to index
    %c2_49 = arith.constant 2 : index
    %c0_50 = arith.constant 0 : index
    %c0_51 = arith.constant 0 : index
    %115 = vector.load %arg5[%114, %c2_49, %c0_50, %c0_51] : memref<1x3x128x128xf32, #tpu.memory_space<vmem>>, vector<1x1x128x128xf32>
    %116 = vector.shape_cast %115 : vector<1x1x128x128xf32> to vector<128x128xf32>
    %117 = vector.broadcast %39 : f32 to vector<128x128xf32>
    %118 = arith.mulf %116, %117 : vector<128x128xf32>
    %119 = vector.broadcast %42 : f32 to vector<128x128xf32>
    %120 = arith.addf %118, %119 : vector<128x128xf32>
    %cst_52 = arith.constant 0.000000e+00 : f32
    %cst_53 = arith.constant 1.000000e+00 : f32
    %121 = vector.broadcast %cst_52 : f32 to vector<128x128xf32>
    %122 = arith.maximumf %121, %120 : vector<128x128xf32>
    %123 = vector.broadcast %cst_53 : f32 to vector<128x128xf32>
    %124 = arith.minimumf %123, %122 : vector<128x128xf32>
    %125 = tpu.dynamic_rotate %124 by %64 dim 0 : vector<128x128xf32>, i32 -> vector<128x128xf32>
    %126 = tpu.dynamic_rotate %125 by %75 dim 1 : vector<128x128xf32>, i32 -> vector<128x128xf32>
    %cst_54 = arith.constant 0.000000e+00 : f32
    %127 = vector.broadcast %cst_54 : f32 to vector<128x128xf32>
    %128 = arith.select %53, %126, %127 : vector<128x128xi1>, vector<128x128xf32>
    %129 = arith.index_cast %c0_i32 : i32 to index
    %c2_55 = arith.constant 2 : index
    %c0_56 = arith.constant 0 : index
    %c0_57 = arith.constant 0 : index
    %130 = vector.load %arg6[%129, %c2_55, %c0_56, %c0_57] : memref<1x3x128x128xf32, #tpu.memory_space<vmem>>, vector<1x1x128x128xf32>
    %131 = vector.shape_cast %130 : vector<1x1x128x128xf32> to vector<128x128xf32>
    %132 = vector.shape_cast %128 : vector<128x128xf32> to vector<1x1x128x128xf32>
    tpu.vector_store %arg6[%129, %c2_55, %c0_56, %c0_57], %132 {strides = array<i32>} : memref<1x3x128x128xf32, #tpu.memory_space<vmem>>, vector<1x1x128x128xf32>,
    %c1_i32_58 = arith.constant 1 : i32
    return
  }
  func.func @transform_0(%arg0: i32, %arg1: memref<2xi32, #tpu.memory_space<smem>>, %arg2: memref<2xi32, #tpu.memory_space<smem>>, %arg3: memref<2xf32, #tpu.memory_space<smem>>, %arg4: memref<2xf32, #tpu.memory_space<smem>>) -> (i32, i32, i32, i32) {
    %c0_i32 = arith.constant 0 : i32
    %c0_i32_0 = arith.constant 0 : i32
    %c0_i32_1 = arith.constant 0 : i32
    %c0_i32_2 = arith.constant 0 : i32
    return %arg0, %c0_i32, %c0_i32_0, %c0_i32_1 : i32, i32, i32, i32
  }
  func.func @transform_1(%arg0: i32, %arg1: memref<2xi32, #tpu.memory_space<smem>>, %arg2: memref<2xi32, #tpu.memory_space<smem>>, %arg3: memref<2xf32, #tpu.memory_space<smem>>, %arg4: memref<2xf32, #tpu.memory_space<smem>>) -> (i32, i32, i32, i32) {
    %c0_i32 = arith.constant 0 : i32
    %c0_i32_0 = arith.constant 0 : i32
    %c0_i32_1 = arith.constant 0 : i32
    %c0_i32_2 = arith.constant 0 : i32
    return %arg0, %c0_i32, %c0_i32_0, %c0_i32_1 : i32, i32, i32, i32
  }
}

</mosaic_0001>

<bundles_post_ra>
// kernel: tpu_custom_call.1
= control target key start
LH: loop header
LB: loop body
LE: loop exit
PB: predicated region body
PF: predicated region fallthrough
CT: control target
= control target key end

     0   :  { %s3426_s0 = inlined_call_operand.hbm [shape: s32[2], index: 0, kind: input, shape index: {}]   ;;  %s3427_s4 = inlined_call_operand.hbm [shape: f32[2,3,128,128], index: 4, kind: input, shape index: {}]   ;;  %s3428_s5 = inlined_call_operand.hbm [shape: f32[2,3,128,128], index: 5, kind: output, shape index: {}]   ;;  %s3429_s1 = inlined_call_operand.vmem [shape: s32[2], index: 1, kind: input, shape index: {}]   ;;  %s3430_s2 = inlined_call_operand.vmem [shape: f32[2], index: 2, kind: input, shape index: {}]   ;;  %s3431_s3 = inlined_call_operand.vmem [shape: f32[2], index: 3, kind: input, shape index: {}]  }
   0x1   :  { %s1478_s20 = scalar_lea.hbm %s3426_s0, 16 }
   0x2   :  { %p1479_p0 = scmp.ne.s32.totalorder %s3426_s0, %s1478_s20  ;;  %p1482_p1 = scmp.lt.u32.totalorder %s1478_s20, %s3426_s0 }
   0x4   :  { %p1484_p2 = pnand %p1482_p1, %p1479_p0 }
   0x6   :  { %1487 = shalt.err (!%p1484_p2)  }
   0x7   :  { %s1624_s25 = smov [#allocation3]   ;;  %s12_s30 = sshll.u32 %s3429_s1, 4  ;;  %s13_s30 = int_to_ptr.vmem [resolvable:$true] %s12_s30 }
   0x8   :  { %11 = dma.hbm_to_smem %s3426_s0, 16, %s1624_s25, [#allocation2] }
   0x9   :  { %s16_s8 = sshll.u32 %s3430_s2, 4  ;;  %s1488_s9 = scalar_lea.vmem %s13_s30, 16  ;;  %s17_s8 = int_to_ptr.vmem [resolvable:$true] %s16_s8 }
   0xa   :  { %p1489_p3 = scmp.ne.s32.totalorder %s13_s30, %s1488_s9  ;;  %p1493_p4 = scmp.lt.s32.totalorder %s13_s30, %s13_s30 }
   0xb   :  { %p1494_p5 = scmp.lt.s32.totalorder %s1488_s9, %s1488_s9 }
   0xd   :  { %p1495_p6 = por %p1494_p5, %p1493_p4 }
   0xf   :  { %p1496_p7 = pnand %p1495_p6, %p1489_p3 }
  0x11   :  { %1499 = shalt.err (!%p1496_p7)  }
  0x12   :  { %s1625_s10 = smov [#allocation4]   ;;  %s20_s12 = sshll.u32 %s3431_s3, 4  ;;  %s21_s12 = int_to_ptr.vmem [resolvable:$true] %s20_s12 }
  0x13   :  { %15 = dma.vmem_to_smem %s13_s30, 16, %s1625_s10, [#allocation2] }
  0x14   :  { %s1500_s1 = scalar_lea.vmem %s17_s8, 16  ;;  %p1505_p9 = scmp.lt.s32.totalorder %s17_s8, %s17_s8 }
  0x15   :  { %p1501_p8 = scmp.ne.s32.totalorder %s17_s8, %s1500_s1  ;;  %p1506_p10 = scmp.lt.s32.totalorder %s1500_s1, %s1500_s1 }
  0x17   :  { %p1507_p11 = por %p1506_p10, %p1505_p9 }
  0x19   :  { %p1508_p12 = pnand %p1507_p11, %p1501_p8 }
  0x1b   :  { %1511 = shalt.err (!%p1508_p12)  }
  0x1c   :  { %s1626_s2 = smov [#allocation5]   ;;  %s1512_s13 = scalar_lea.vmem %s21_s12, 16 }
  0x1d   :  { %19 = dma.vmem_to_smem %s17_s8, 16, %s1626_s2, [#allocation2] }
  0x1e   :  { %p1513_p13 = scmp.ne.s32.totalorder %s21_s12, %s1512_s13  ;;  %p1517_p0 = scmp.lt.s32.totalorder %s21_s12, %s21_s12 }
  0x1f   :  { %p1518_p1 = scmp.lt.s32.totalorder %s1512_s13, %s1512_s13 }
  0x21   :  { %p1519_p2 = por %p1518_p1, %p1517_p0 }
  0x23   :  { %p1520_p3 = pnand %p1519_p2, %p1513_p13 }
  0x25   :  { %1523 = shalt.err (!%p1520_p3)  }
  0x26   :  { %s1627_s14 = smov [#allocation6]  }
  0x27   :  { %23 = dma.vmem_to_smem %s21_s12, 16, %s1627_s14, [#allocation2] }
  0x28   :  { %1598 = dma.done.wait [#allocation2], 64 }
  0x29   :  { %1599 = vsyncadd [#allocation2], 4294967232 }
  0x2a   :  { %25 = sfence }
  0x2b   :  { %26 = vsyncpa [#allocation8], 0 }
  0x2c   :  { %28 = vsyncpa [#allocation8 + $0x1], 0 }
  0x2d   :  { %29 = vsyncpa [#allocation9], 0 }
  0x2e   :  { %31 = vsyncpa [#allocation9 + $0x1], 0  ;;  %s1685_s3 = smov 0   ;;  %s1687_s15 = smov 0  }
  0x2f   :  { %s1689_s16 = smov 0   ;;  %s1691_s17 = smov 0  }
  0x30 LB: > { %s1706_s18 = sadd.s32 4294967295, %s1622_s17   ;;  %s1292_s19 = sadd.s32 4294967294, %s1622_s17   ;;  %s1622_s17 = sphi %s1691_s17, %s3568_s17   ;;  %s1618_s16 = sphi %s1689_s16, %s3567_s16   ;;  %s1614_s15 = sphi %s1687_s15, %s3566_s15   ;;  %s1610_s3 = sphi %s1685_s3, %s3565_s3  }
  0x31   : > { %s1710_s20 = sadd.s32 1, %s1622_s17   ;;  %s44_s21 = sadd.s32 1, %s1618_s16 }
  0x32   : > { %s41_s22 = ssub.s32 %s1622_s17, %s1710_s20  ;;  %p51_p4 = scmp.ne.s32.totalorder %s1618_s16, %s1614_s15 }
  0x33   : > { %p42_p5 = scmp.eq.s32.totalorder %s41_s22, 0  ;;  %p52_p6 = scmp.eq.s32.totalorder %s1622_s17, 0 }
  0x34   : > { %p57_p7 = scmp.ne.s32.totalorder %s1614_s15, %s1610_s3  ;;  %p58_p8 = scmp.eq.s32.totalorder %s1706_s18, 0 }
  0x35   : > { %s1722_s23 = scalar_select %p42_p5, %s1618_s16, %s44_s21  }
  0x36   : > { %p53_p9 = por %p52_p6, %p51_p4  ;;  %p1724_p10 = por %p58_p8, %p57_p7 }
  0x37   : > { %p81_p11 = scmp.eq.s32.totalorder %s1706_s18, 1  ;;  %p87_p12 = scmp.eq.s32.totalorder %s1292_s19, 1 }
  0x38   : > { %p1436_p0 = scmp.lt.s32.totalorder %s1622_s17, 2  ;;  %s107_s27 = sand.u32 1, %s1618_s16  }
  0x39   : > { %p1731_p1 = por %p81_p11, %p51_p4  ;;  %p1735_p2 = por %p87_p12, %p57_p7 }
  0x3a   : > { %s1419_s28 = smul.u32 6144, %s1622_s17  ;;  %p1746_p3 = pnand %p1436_p0, %p53_p9 }
  0x3b   : > { %s3456_s25 = scalar_select %p1731_p1, 1, 0 }
  0x3c   : > { %s3457_s26 = scalar_select %p1735_p2, 1, 0 }
  0x3d   : > { %s1418_s29 = smul.u32 384, %s107_s27  ;;  %s1744_s7 = scalar_lea.hbm %s3427_s4, %s1419_s28 }
  0x3e   : > { %s1752_s0 = scalar_lea.sflag [#allocation8], %s107_s27  ;;  %s1524_s11 = scalar_lea.hbm %s1744_s7, 6144 }
  0x3f   : > { %s111_s9 = scalar_lea.vmem [#allocation7], %s1418_s29  ;;  %p1525_p4 = scmp.ne.s32.totalorder %s1744_s7, %s1524_s11 }
  0x40   : > { %s118_s10 = sshll.u32 %s111_s9, 4  ;;  %p1526_p5 = pneg %p1746_p3  ;;  %s1750_s10 = int_to_ptr.vmem [resolvable:$true] %s118_s10 }
  0x41   : > { %s1529_s2 = scalar_lea.hbm %s3427_s4, 12288  ;;  %p1530_p8 = scmp.lt.u32.totalorder %s1744_s7, %s3427_s4 }
  0x42   : > { %p1527_p6 = pnand %p1526_p5, %p1525_p4  ;;  %p1531_p9 = scmp.lt.u32.totalorder %s1529_s2, %s1524_s11 }
  0x43   : > { %p1533_p12 = scmp.lt.u32.totalorder %s1524_s11, %s1744_s7 }
  0x44   : > { %p1528_p7 = pneg %p1527_p6  ;;  %p1532_p11 = por %p1531_p9, %p1530_p8 }
  0x46   : > { %p1534_p0 = por %p1533_p12, %p1532_p11 }
  0x48   : > { %p1535_p13 = pnand %p1534_p0, %p1528_p7 }
  0x4a   : > { %1538 = shalt.err (!%p1535_p13)
}
  0x4b   : > { %s1539_s19 = scalar_lea.vmem %s1750_s10, 6144  ;;  %s1628_s21 = smov [#allocation7]  }
  0x4c   : > { %p1540_p4 = scmp.ne.s32.totalorder %s1750_s10, %s1539_s19  ;;  %s1544_s22 = sshll.u32 %s1628_s21, 4  ;;  %s1545_s22 = int_to_ptr.vmem [resolvable:$false] %s1544_s22 }
  0x4d   : > { %s1546_s27 = scalar_lea.vmem %s1545_s22, 12288  ;;  %p1547_p1 = scmp.lt.s32.totalorder %s1750_s10, %s1545_s22 }
  0x4e   : > { %p1542_p6 = pnand %p1540_p4, %p1526_p5  ;;  %p1548_p8 = scmp.lt.s32.totalorder %s1546_s27, %s1539_s19 }
  0x50   : > { %p1543_p2 = pneg %p1542_p6  ;;  %p1549_p9 = por %p1548_p8, %p1547_p1 }
  0x52   : > { %p1550_p11 = pnand %p1549_p9, %p1543_p2 }
  0x54   : > { %1553 = shalt.err (!%p1550_p11)
}
  0x55   : > { %s1629_s28 = smov 128   ;;  %s1630_s29 = smov 8  }
  0x56   : > { %1431 = dma.hbm_to_vmem [thread:$0]  (!%p1746_p3), %s1744_s7, 6144, %s1750_s10, %s1752_s0, %s1629_s28, %s1629_s28, %s1630_s29  }
  0x57   : > { %p1296_p13 = scmp.ge.s32.totalorder %s1622_s17, 1  ;;  %p126_p5 = scmp.lt.s32.totalorder %s1622_s17, 3 }
  0x59   : > { %p127_p7 = pnand %p1296_p13, %p126_p5 }
  0x5b   : > { %130 = sbr.rel (%p127_p7) target bundleno = 635 (0x27b), region = 24 }
  0x62   : > { %s1783_s30 = sand.u32 1, %s1614_s15  }
  0x63   : > { %s1420_s6 = smul.u32 384, %s1783_s30  ;;  %s133_s9 = scalar_lea.sflag [#allocation8], %s1783_s30 }
  0x65   : > { %s1789_s11 = scalar_lea.vmem [#allocation7], %s1420_s6 }
  0x66   : > { %1601 = dma.done.wait (%p1724_p10), %s133_s9, 6144  }
  0x67   : > { %1603 = vsyncadd (%p1724_p10), %s133_s9, 4294961152  ;;  %v1796_v0 = vld [vmem:[%s1789_s11] sm:$0xff]  ;;  %v1802_v2 = vld [vmem:[%s1789_s11 + $0x8] sm:$0xff]  ;;  %p174_p10 = scmp.lt.s32.totalorder %s1706_s18, 1  ;;  %p3562_p11 = scmp.ne.s32.totalorder %s3456_s25, 0 }
  0x68   : > { %v1799_v1 = vld [vmem:[%s1789_s11 + $0x80] sm:$0xff]  ;;  %v1805_v3 = vld [vmem:[%s1789_s11 + $0x88] sm:$0xff]  ;;  %v1808_v4 = vld [vmem:[%s1789_s11 + $0x10] sm:$0xff]  ;;  %v204_v5 = vmul.f32 0.299, %v1796_v0 }
  0x69   : > { %v1812_v6 = vld [vmem:[%s1789_s11 + $0x90] sm:$0xff]  ;;  %v237_v7 = vmul.f32 0.587, %v1799_v1  ;;  %v1816_v8 = vld [vmem:[%s1789_s11 + $0x18] sm:$0xff]  ;;  %v205_v9 = vmul.f32 0.299, %v1802_v2 }
  0x6a   : > { %v238_v10 = vmul.f32 0.587, %v1805_v3  ;;  %v1821_v11 = vld [vmem:[%s1789_s11 + $0x98] sm:$0xff]  ;;  %v1824_v12 = vld [vmem:[%s1789_s11 + $0x100] sm:$0xff]  ;;  %v1827_v13 = vld [vmem:[%s1789_s11 + $0x108] sm:$0xff]  ;;  %s1989_s24 = scalar_select %p174_p10, %s1706_s18, 1 }
  0x6b   : > { %v1830_v14 = vld [vmem:[%s1789_s11 + $0x20] sm:$0xff]  ;;  %v1833_v15 = vld [vmem:[%s1789_s11 + $0x28] sm:$0xff]  ;;  %v206_v16 = vmul.f32 0.299, %v1808_v4  ;;  %v239_v17 = vmul.f32 0.587, %v1812_v6  ;;  %v253_v21 = vadd.f32 %v237_v7, %v204_v5 }
  0x6c   : > { %v207_v18 = vmul.f32 0.299, %v1816_v8  ;;  %v1839_v19 = vld [vmem:[%s1789_s11 + $0xa0] sm:$0xff]  ;;  %v1842_v20 = vld [vmem:[%s1789_s11 + $0xa8] sm:$0xff]  ;;  %v1845_v22 = vld [vmem:[%s1789_s11 + $0x110] sm:$0xff]  ;;  %v254_v24 = vadd.f32 %v238_v10, %v205_v9  ;;  %s181_s7 = sld [smem:[#allocation4 + %s1989_s24]] }
  0x6d   : > { %v240_v23 = vmul.f32 0.587, %v1821_v11  ;;  %v286_v25 = vmul.f32 0.114, %v1824_v12  ;;  %v287_v26 = vmul.f32 0.114, %v1827_v13  ;;  %v255_v31 = vadd.f32 %v239_v17, %v206_v16 }
  0x6e   : > { %v1851_v27 = vld [vmem:[%s1789_s11 + $0x30] sm:$0xff]  ;;  %v1854_v28 = vld [vmem:[%s1789_s11 + $0x118] sm:$0xff]  ;;  %v208_v29 = vmul.f32 0.299, %v1830_v14  ;;  %v241_v30 = vmul.f32 0.587, %v1839_v19 }
  0x6f   : > { %3459 = vst [vmem:[#allocation14_spill] sm:$0xff] %v1854_v28  ;;  %v288_v32 = vmul.f32 0.114, %v1845_v22  ;;  %v209_v33 = vmul.f32 0.299, %v1833_v15  ;;  %v1861_v34 = vld [vmem:[%s1789_s11 + $0xb0] sm:$0xff]  ;;  %v256_v39 = vadd.f32 %v240_v23, %v207_v18  ;;  %v302_v41 = vadd.f32 %v286_v25, %v253_v21 }
  0x70   : > { %v242_v35 = vmul.f32 0.587, %v1842_v20  ;;  %v1865_v36 = vld [vmem:[%s1789_s11 + $0x120] sm:$0xff]  ;;  %v1868_v37 = vld [vmem:[%s1789_s11 + $0x38] sm:$0xff]  ;;  %v289_v40 = vmul.f32 0.114, %v1854_v28  ;;  %v303_v42 = vadd.f32 %v287_v26, %v254_v24  ;;  %v257_v48 = vadd.f32 %v241_v30, %v208_v29 }
  0x71   : > { %3460 = vst [vmem:[#allocation15_spill] sm:$0xff] %v1865_v36  ;;  %v1871_v38 = vld [vmem:[%s1789_s11 + $0xb8] sm:$0xff]  ;;  %v210_v43 = vmul.f32 0.299, %v1851_v27  ;;  %v1876_v44 = vld [vmem:[%s1789_s11 + $0x128] sm:$0xff]  ;;  %v1879_v45 = vld [vmem:[%s1789_s11 + $0x40] sm:$0xff]  ;;  %v304_v50 = vadd.f32 %v288_v32, %v255_v31 }
  0x72   : > { %3461 = vst [vmem:[#allocation16_spill] sm:$0xff] %v1876_v44  ;;  %v1882_v46 = vld [vmem:[%s1789_s11 + $0xc0] sm:$0xff]  ;;  %v243_v47 = vmul.f32 0.587, %v1861_v34  ;;  %v290_v49 = vmul.f32 0.114, %v1865_v36  ;;  %v258_v56 = vadd.f32 %v242_v35, %v209_v33  ;;  %v305_v58 = vadd.f32 %v289_v40, %v256_v39 }
  0x73   : > { %v211_v51 = vmul.f32 0.299, %v1868_v37  ;;  %v244_v52 = vmul.f32 0.587, %v1871_v38  ;;  %v1889_v53 = vld [vmem:[%s1789_s11 + $0x130] sm:$0xff]  ;;  %v1892_v54 = vld [vmem:[%s1789_s11 + $0x48] sm:$0xff]  ;;  %v318_v59 = vadd.f32 %v303_v42, %v302_v41 }
  0x74   : > { %3462 = vst [vmem:[#allocation17_spill] sm:$0xff] %v1889_v53  ;;  %v1895_v55 = vld [vmem:[%s1789_s11 + $0xc8] sm:$0xff]  ;;  %v291_v57 = vmul.f32 0.114, %v1876_v44  ;;  %v212_v60 = vmul.f32 0.299, %v1879_v45  ;;  %v259_v7 = vadd.f32 %v243_v47, %v210_v43  ;;  %v306_v10 = vadd.f32 %v290_v49, %v257_v48 }
  0x75   : > { %v245_v61 = vmul.f32 0.587, %v1882_v46  ;;  %v1901_v62 = vld [vmem:[%s1789_s11 + $0x138] sm:$0xff]  ;;  %v1904_v63 = vld [vmem:[%s1789_s11 + $0x50] sm:$0xff]  ;;  %v292_v9 = vmul.f32 0.114, %v1889_v53  ;;  %v319_v16 = vadd.f32 %v318_v59, %v304_v50  ;;  %v260_v25 = vadd.f32 %v244_v52, %v211_v51 }
  0x76   : > { %3463 = vst [vmem:[#allocation18_spill] sm:$0xff] %v1901_v62  ;;  %v1907_v5 = vld [vmem:[%s1789_s11 + $0xd0] sm:$0xff]  ;;  %v213_v17 = vmul.f32 0.299, %v1892_v54  ;;  %v246_v18 = vmul.f32 0.587, %v1895_v55  ;;  %v307_v29 = vadd.f32 %v291_v57, %v258_v56 }
  0x77   : > { %v1913_v21 = vld [vmem:[%s1789_s11 + $0x140] sm:$0xff]  ;;  %v1916_v23 = vld [vmem:[%s1789_s11 + $0x58] sm:$0xff]  ;;  %v293_v26 = vmul.f32 0.114, %v1901_v62  ;;  %v320_v30 = vadd.f32 %v319_v16, %v305_v58  ;;  %v214_v31 = vmul.f32 0.299, %v1904_v63  ;;  %v261_v40 = vadd.f32 %v245_v61, %v212_v60 }
  0x78   : > { %3464 = vst [vmem:[#allocation19_spill] sm:$0xff] %v1913_v21  ;;  %v1919_v24 = vld [vmem:[%s1789_s11 + $0xd8] sm:$0xff]  ;;  %v247_v32 = vmul.f32 0.587, %v1907_v5  ;;  %v1925_v33 = vld [vmem:[%s1789_s11 + $0x148] sm:$0xff]  ;;  %v1928_v35 = vld [vmem:[%s1789_s11 + $0x60] sm:$0xff]  ;;  %v308_v42 = vadd.f32 %v292_v9, %v259_v7  ;;  %v262_v52 = vadd.f32 %v246_v18, %v213_v17 }
  0x79   : > { %3465 = vst [vmem:[#allocation20_spill] sm:$0xff] %v1925_v33  ;;  %v1931_v39 = vld [vmem:[%s1789_s11 + $0xe0] sm:$0xff]  ;;  %v294_v41 = vmul.f32 0.114, %v1913_v21  ;;  %v321_v43 = vadd.f32 %v320_v30, %v306_v10  ;;  %v215_v47 = vmul.f32 0.299, %v1916_v23  ;;  %v309_v57 = vadd.f32 %v293_v26, %v260_v25 }
  0x7a   : > { %v248_v48 = vmul.f32 0.587, %v1919_v24  ;;  %v1937_v49 = vld [vmem:[%s1789_s11 + $0x150] sm:$0xff]  ;;  %v1940_v50 = vld [vmem:[%s1789_s11 + $0x68] sm:$0xff]  ;;  %v295_v56 = vmul.f32 0.114, %v1925_v33  ;;  %v263_v10 = vadd.f32 %v247_v32, %v214_v31 }
  0x7b   : > { %3466 = vst [vmem:[#allocation21_spill] sm:$0xff] %v1937_v49  ;;  %v1943_v51 = vld [vmem:[%s1789_s11 + $0xe8] sm:$0xff]  ;;  %v322_v58 = vadd.f32 %v321_v43, %v307_v29  ;;  %v216_v59 = vmul.f32 0.299, %v1928_v35  ;;  %v249_v60 = vmul.f32 0.587, %v1931_v39  ;;  %v310_v17 = vadd.f32 %v294_v41, %v261_v40 }
  0x7c   : > { %v1949_v61 = vld [vmem:[%s1789_s11 + $0x158] sm:$0xff]  ;;  %v1952_v7 = vld [vmem:[%s1789_s11 + $0x70] sm:$0xff]  ;;  %v296_v16 = vmul.f32 0.114, %v1937_v49  ;;  %v217_v30 = vmul.f32 0.299, %v1940_v50  ;;  %v264_v33 = vadd.f32 %v248_v48, %v215_v47  ;;  %v311_v62 = vadd.f32 %v295_v56, %v262_v52 }
  0x7d   : > { %3467 = vst [vmem:[#allocation22_spill] sm:$0xff] %v1949_v61  ;;  %v1955_v9 = vld [vmem:[%s1789_s11 + $0xf0] sm:$0xff]  ;;  %v323_v18 = vadd.f32 %v322_v58, %v308_v42  ;;  %v250_v25 = vmul.f32 0.587, %v1943_v51  ;;  %v1961_v26 = vld [vmem:[%s1789_s11 + $0x160] sm:$0xff]  ;;  %v1964_v29 = vld [vmem:[%s1789_s11 + $0x78] sm:$0xff]  ;;  %v265_v42 = vadd.f32 %v249_v60, %v216_v59 }
  0x7e   : > { %3468 = vst [vmem:[#allocation23_spill] sm:$0xff] %v1961_v26  ;;  %v1967_v43 = vld [vmem:[%s1789_s11 + $0xf8] sm:$0xff]  ;;  %v297_v21 = vmul.f32 0.114, %v1949_v61  ;;  %v218_v32 = vmul.f32 0.299, %v1952_v7  ;;  %v312_v49 = vadd.f32 %v296_v16, %v263_v10 }
  0x7f   : > { %v324_v31 = vadd.f32 %v323_v18, %v309_v57  ;;  %v251_v40 = vmul.f32 0.587, %v1955_v9  ;;  %v1973_v41 = vld [vmem:[%s1789_s11 + $0x168] sm:$0xff]  ;;  %v298_v58 = vmul.f32 0.114, %v1961_v26  ;;  %v1979_v48 = vld [vmem:[%s1789_s11 + $0x170] sm:$0xff]  ;;  %v266_v52 = vadd.f32 %v250_v25, %v217_v30 }
  0x80   : > { %3469 = vst [vmem:[#allocation24_spill] sm:$0xff] %v1973_v41  ;;  %v219_v44 = vmul.f32 0.299, %v1964_v29  ;;  %v252_v47 = vmul.f32 0.587, %v1967_v43  ;;  %v313_v57 = vadd.f32 %v297_v21, %v264_v33  ;;  %v1983_v61 = vld [vmem:[%s1789_s11 + $0x178] sm:$0xff] }
  0x81   : > { %v325_v53 = vadd.f32 %v324_v31, %v310_v17  ;;  %v299_v56 = vmul.f32 0.114, %v1973_v41  ;;  %v267_v36 = vadd.f32 %v251_v40, %v218_v32  ;;  %v300_v59 = vmul.f32 0.114, %v1979_v48  ;;  %p182_p1 = scmp.gt.s32.totalorder %s181_s7, 0  ;;  %p1302_p2 = scmp.lt.s32.totalorder %s181_s7, 8 }
  0x82   : > { %v314_v60 = vadd.f32 %v298_v58, %v265_v42  ;;  %v268_v16 = vadd.f32 %v252_v47, %v219_v44  ;;  %v301_v17 = vmul.f32 0.114, %v1983_v61  ;;  %v155_v44 = vlaneseq  ;;  %s176_s10 = sld [smem:[#allocation3 + %s1989_s24]] }
  0x83   : > { %v326_v18 = vadd.f32 %v325_v53, %v311_v62  ;;  %v315_v31 = vadd.f32 %v299_v56, %v266_v52  ;;  %v316_v28 = vadd.f32 %v300_v59, %v267_v36  ;;  %s3570_s7 = smov (!%p182_p1, %s181_s7), 0  ;;  %s2002_s14 = sld [smem:[#allocation5 + %s1989_s24]] }
  0x84   : > { %v317_v25 = vadd.f32 %v301_v17, %v268_v16  ;;  %v173_v62 = vand.u32 127, %v155_v44  ;;  %s3572_s7 = smov (!%p1302_p2, %s3570_s7), 8  ;;  %s2005_s19 = sld [smem:[#allocation6 + %s1989_s24]] }
  0x85   : > { %v327_v10 = vadd.f32 %v326_v18, %v312_v49  ;;  %s1340_s8 = sadd.s32 4294967292, %s3572_s7 }
  0x86   : > { %v384_v36 = vstv %s1340_s8 }
  0x87   : > { %v328_v26 = vadd.f32 %v327_v10, %v313_v57  ;;  %v1995_v33 = vadd.s32 %v384_v36, %v173_v62  ;;  %v3481_v36 = vld [vmem:[#allocation19_spill] sm:$0xff] }
  0x88   : > { %p177_p3 = scmp.gt.s32.totalorder %s176_s10, 0  ;;  %p1297_p12 = scmp.lt.s32.totalorder %s176_s10, 8 }
  0x89   : > { %v329_v30 = vadd.f32 %v328_v26, %v314_v60  ;;  %3470 = vst [vmem:[#allocation25_spill] sm:$0xff] %v1995_v33 }
  0x8a   : > { %s3574_s10 = smov (!%p177_p3, %s176_s10), 0  ;;  %s345_s22 = smul.f32 %s2005_s19, %s2002_s14 }
  0x8b   : > { %v330_v41 = vadd.f32 %v329_v30, %v315_v31  ;;  %s3576_s10 = smov (!%p1297_p12, %s3574_s10), 8 }
  0x8c   : > { %s403_s0 = ssub.s32 4, %s3576_s10  ;;  %v2009_v58 = vstv %s345_s22 }
  0x8d   : > { %v331_v21 = vadd.f32 %v330_v41, %v316_v28  ;;  %s405_s12 = ssub.s32 0, %s403_s0  ;;  %p404_p0 = scmp.lt.s32.totalorder %s403_s0, 0  ;;  %v2015_v47 = vmul.f32 %v2009_v58, %v1892_v54  ;;  %v2019_v52 = vmul.f32 %v2009_v58, %v1904_v63  ;;  %v2023_v56 = vmul.f32 %v2009_v58, %v1916_v23 }
  0x8e   : > { %s1341_s1 = smin.u32 %s405_s12, %s403_s0  ;;  %v2027_v57 = vmul.f32 %v2009_v58, %v1928_v35  ;;  %v2032_v18 = vmul.f32 %v2009_v58, %v1940_v50  ;;  %v2036_v54 = vmul.f32 %v2009_v58, %v1952_v7  ;;  %v2040_v63 = vmul.f32 %v2009_v58, %v1964_v29 }
  0x8f   : > { %v332_v53 = vadd.f32 %v331_v21, %v317_v25  ;;  %s407_s2 = sand.u32 127, %s1341_s1   ;;  %v2042_v23 = vshrl.u32 %v155_v44, 7  ;;  %v430_v35 = vmul.f32 %v2009_v58, %v1796_v0  ;;  %v431_v50 = vmul.f32 %v2009_v58, %v1802_v2  ;;  %v3472_v25 = vld [vmem:[#allocation14_spill] sm:$0xff]  ;;  %v3473_v21 = vld [vmem:[#allocation15_spill] sm:$0xff] }
  0x90   : > { %s408_s13 = ssub.s32 0, %s407_s2  ;;  %v432_v7 = vmul.f32 %v2009_v58, %v1808_v4  ;;  %v433_v59 = vmul.f32 %v2009_v58, %v1816_v8  ;;  %v434_v29 = vmul.f32 %v2009_v58, %v1830_v14  ;;  %v435_v60 = vmul.f32 %v2009_v58, %v1833_v15 }
  0x91   : > { %333 = vadd.xlane.f32.xlu0 %v332_v53  ;;  %s3578_s13 = smov (!%p404_p0, %s408_s13), %s407_s2  ;;  %3471 = vst [vmem:[#allocation26_spill] sm:$0xff] %v2042_v23  ;;  %v436_v10 = vmul.f32 %v2009_v58, %v1851_v27  ;;  %v437_v0 = vmul.f32 %v2009_v58, %v1868_v37  ;;  %v438_v8 = vmul.f32 %v2009_v58, %v1879_v45  ;;  %s347_s2 = ssub.f32 1.0, %s2005_s19 }
  0x92   : > { %p1343_p4 = scmp.lt.s32.totalorder %s3578_s13, 0  ;;  %s414_s21 = sadd.s32 128, %s3578_s13  ;;  %v2075_v27 = vmul.f32 %v1799_v1, %v2009_v58  ;;  %v2079_v37 = vmul.f32 %v1805_v3, %v2009_v58  ;;  %v2083_v45 = vmul.f32 %v1812_v6, %v2009_v58  ;;  %v2087_v31 = vmul.f32 %v1821_v11, %v2009_v58 }
  0x93   : > { %v2091_v30 = vmul.f32 %v1839_v19, %v2009_v58  ;;  %v2096_v1 = vmul.f32 %v1842_v20, %v2009_v58  ;;  %v2100_v3 = vmul.f32 %v1861_v34, %v2009_v58  ;;  %v2104_v6 = vmul.f32 %v1871_v38, %v2009_v58  ;;  %s2128_s19 = ssub.s32 4, %s3572_s7 }
  0x94   : > { %s3580_s21 = smov (!%p1343_p4, %s414_s21), %s3578_s13  ;;  %v2108_v11 = vmul.f32 %v1882_v46, %v2009_v58  ;;  %v2112_v19 = vmul.f32 %v1895_v55, %v2009_v58  ;;  %v2116_v20 = vmul.f32 %v1907_v5, %v2009_v58  ;;  %v2120_v34 = vmul.f32 %v1919_v24, %v2009_v58  ;;  %p417_p6 = scmp.lt.s32.totalorder %s2128_s19, 0 }
  0x95   : > { %s495_s27 = sand.u32 127, %s3580_s21   ;;  %v2124_v38 = vmul.f32 %v1931_v39, %v2009_v58  ;;  %v2132_v46 = vmul.f32 %v1943_v51, %v2009_v58  ;;  %v2136_v55 = vmul.f32 %v1955_v9, %v2009_v58  ;;  %v2140_v5 = vmul.f32 %v1967_v43, %v2009_v58 }
  0x96   : > { %s2011_s28 = sand.u32 7, %s495_s27   ;;  %s497_s29 = sshrl.u32 %s495_s27, 3  ;;  %v2144_v24 = vmul.f32 %v1824_v12, %v2009_v58  ;;  %v2148_v39 = vmul.f32 %v1827_v13, %v2009_v58  ;;  %v2152_v51 = vmul.f32 %v1845_v22, %v2009_v58  ;;  %v2156_v9 = vmul.f32 %v3472_v25, %v2009_v58  ;;  %v3475_v12 = vld [vmem:[#allocation16_spill] sm:$0xff]  ;;  %v3477_v13 = vld [vmem:[#allocation17_spill] sm:$0xff]  ;;  %v3479_v22 = vld [vmem:[#allocation18_spill] sm:$0xff] }
  0x97   : > { %s498_s9 = ssub.s32 8, %s2011_s28  ;;  %s549_s11 = sand.u32 1, %s497_s29  ;;  %v2160_v43 = vmul.f32 %v3473_v21, %v2009_v58  ;;  %v2164_v53 = vmul.f32 %v3475_v12, %v2009_v58  ;;  %v2168_v44 = vmul.f32 %v3477_v13, %v2009_v58  ;;  %v2172_v62 = vmul.f32 %v3479_v22, %v2009_v58  ;;  %v3489_v25 = vld [vmem:[#allocation23_spill] sm:$0xff]  ;;  %v3491_v13 = vld [vmem:[#allocation24_spill] sm:$0xff] }
  0x98   : > { %s568_s24 = sand.u32 2, %s497_s29  ;;  %s587_s8 = sand.u32 4, %s497_s29  ;;  %v2060_v2 = vstv %s498_s9  ;;  %v2063_v4 = vstv %s549_s11  ;;  %v2193_v21 = vmul.f32 %v3489_v25, %v2009_v58  ;;  %v2199_v22 = vmul.f32 %v3491_v13, %v2009_v58 }
  0x99   : > { %s606_s0 = sand.u32 8, %s497_s29  ;;  %v2067_v17 = vstv %s568_s24  ;;  %v2069_v14 = vstv %s587_s8  ;;  %3474 = vst [vmem:[#allocation14_spill] sm:$0xff] %v2160_v43  ;;  %3476 = vst [vmem:[#allocation15_spill] sm:$0xff] %v2164_v53  ;;  %vm551_vm1 = vcmp.ne.s32.totalorder %v2063_v4, 0  ;;  %s1339_s9 = sadd.s32 4294967292, %s3576_s10 }
  0x9a   : > { %v2071_v15 = vstv %s606_s0  ;;  %3478 = vst [vmem:[#allocation16_spill] sm:$0xff] %v2168_v44  ;;  %3480 = vst [vmem:[#allocation17_spill] sm:$0xff] %v2172_v62  ;;  %vm570_vm2 = vcmp.ne.s32.totalorder %v2067_v17, 0  ;;  %vm3448_vm3 = vcmp.ne.s32.totalorder %v2069_v14, 0  ;;  %s3225_s10 = scalar_lea.vmem [#allocation10], %s1420_s6  ;;  %s1423_s6 = smul.u32 6144, %s1706_s18 }
  0x9b   : > { %3492 = vst [vmem:[#allocation23_spill] sm:$0xff] %v2199_v22  ;;  %vm3447_vm4 = vcmp.ne.s32.totalorder %v2071_v15, 0  ;;  %s1219_s11 = sshll.u32 %s3225_s10, 4  ;;  %s1206_s18 = scalar_lea.sflag [#allocation9], %s1783_s30  ;;  %s3379_s11 = int_to_ptr.vmem [resolvable:$true] %s1219_s11 }
  0x9c   : > { %s3377_s0 = scalar_lea.hbm %s3428_s5, %s1423_s6 }
 0x11e   : > { %v334_v28 = vpop.xlane.xlu0 %333 }
 0x11f   : > { %v335_v49 = vrot.slane %v334_v28, 4 }
 0x121   : > { %v336_v26 = vadd.f32 %v335_v49, %v334_v28  ;;  %v2176_v28 = vmul.f32 %v3481_v36, %v2009_v58  ;;  %v3483_v49 = vld [vmem:[#allocation20_spill] sm:$0xff]  ;;  %v2203_v36 = vmul.f32 %v1979_v48, %v2009_v58 }
 0x123   : > { %v337_v32 = vrot.slane %v336_v26, 2  ;;  %3482 = vst [vmem:[#allocation18_spill] sm:$0xff] %v2176_v28  ;;  %3493 = vst [vmem:[#allocation24_spill] sm:$0xff] %v2203_v36 }
 0x125   : > { %v338_v40 = vadd.f32 %v337_v32, %v336_v26  ;;  %v2181_v26 = vmul.f32 %v3483_v49, %v2009_v58  ;;  %v3485_v32 = vld [vmem:[#allocation21_spill] sm:$0xff]  ;;  %v2207_v49 = vmul.f32 %v1983_v61, %v2009_v58 }
 0x127   : > { %v339_v41 = vrot.slane %v338_v40, 1  ;;  %3484 = vst [vmem:[#allocation19_spill] sm:$0xff] %v2181_v26  ;;  %3494 = vst [vmem:[#allocation27_spill] sm:$0xff] %v2207_v49 }
 0x129   : > { %v340_v42 = vadd.f32 %v339_v41, %v338_v40  ;;  %v2185_v40 = vmul.f32 %v3485_v32, %v2009_v58  ;;  %v3487_v41 = vld [vmem:[#allocation22_spill] sm:$0xff] }
 0x12a   : > { %3490 = vst [vmem:[#allocation22_spill] sm:$0xff] %v2193_v21 }
 0x12b   : > { %1421 = vpush %v340_v42  ;;  %3486 = vst [vmem:[#allocation20_spill] sm:$0xff] %v2185_v40  ;;  %v2189_v42 = vmul.f32 %v3487_v41, %v2009_v58 }
 0x12d   : > { %3488 = vst [vmem:[#allocation21_spill] sm:$0xff] %v2189_v42 }
 0x15c   : > { %s1422_s12 = spop %1421 }
 0x15d   : > { %s344_s1 = smul.f32 6.1035156e-05, %s1422_s12  ;;  %s1554_s12 = scalar_lea.vmem %s3379_s11, 6144 }
 0x15e   : > { %p1555_p9 = scmp.ne.s32.totalorder %s3379_s11, %s1554_s12 }
 0x15f   : > { %s346_s13 = smul.f32 %s344_s1, %s2002_s14  ;;  %s418_s14 = ssub.s32 0, %s2128_s19 }
 0x160   : > { %s2218_s21 = smin.u32 %s418_s14, %s2128_s19  ;;  %p1556_p13 = pnand %p1555_p9, %p3562_p11 }
 0x161   : > { %s348_s7 = smul.f32 %s347_s2, %s346_s13  ;;  %s420_s22 = sand.u32 127, %s2218_s21  }
 0x162   : > { %s421_s27 = ssub.s32 0, %s420_s22  ;;  %p1557_p5 = pneg %p1556_p13 }
 0x163   : > { %v2195_v12 = vstv %s348_s7  ;;  %s3582_s27 = smov (!%p417_p6, %s421_s27), %s420_s22  ;;  %s1631_s1 = smov [#allocation10]  }
 0x164   : > { %v458_v32 = vadd.f32 %v2195_v12, %v2023_v56  ;;  %v459_v41 = vadd.f32 %v2195_v12, %v2027_v57  ;;  %v460_v25 = vadd.f32 %v2195_v12, %v2032_v18  ;;  %v461_v13 = vadd.f32 %v2195_v12, %v2036_v54  ;;  %p1346_p8 = scmp.lt.s32.totalorder %s3582_s27, 0  ;;  %s1558_s2 = sshll.u32 %s1631_s1, 4  ;;  %s1559_s2 = int_to_ptr.vmem [resolvable:$false] %s1558_s2 }
 0x165   : > { %v462_v48 = vadd.f32 %v2195_v12, %v2040_v63  ;;  %v447_v61 = vadd.f32 %v2195_v12, %v430_v35  ;;  %v448_v58 = vadd.f32 %v2195_v12, %v431_v50  ;;  %v449_v56 = vadd.f32 %v2195_v12, %v432_v7  ;;  %s1560_s13 = scalar_lea.vmem %s1559_s2, 12288  ;;  %p1561_p7 = scmp.lt.s32.totalorder %s3379_s11, %s1559_s2 }
 0x166   : > { %v450_v57 = vadd.f32 %v2195_v12, %v433_v59  ;;  %v451_v18 = vadd.f32 %v2195_v12, %v434_v29  ;;  %v452_v16 = vadd.f32 %v2195_v12, %v435_v60  ;;  %v453_v54 = vadd.f32 %v2195_v12, %v436_v10  ;;  %p1562_p10 = scmp.lt.s32.totalorder %s1560_s13, %s1554_s12 }
 0x167   : > { %v454_v33 = vadd.f32 %v2195_v12, %v437_v0  ;;  %v455_v63 = vadd.f32 %v2195_v12, %v438_v8  ;;  %v456_v35 = vadd.f32 %v2195_v12, %v2015_v47  ;;  %v457_v50 = vadd.f32 %v2195_v12, %v2019_v52 }
 0x168   : > { %v463_v7 = vmax.f32 %v447_v61, 0.0  ;;  %v464_v59 = vmax.f32 %v448_v58, 0.0  ;;  %v465_v29 = vmax.f32 %v449_v56, 0.0  ;;  %v466_v49 = vmax.f32 %v450_v57, 0.0  ;;  %p1563_p1 = por %p1562_p10, %p1561_p7 }
 0x169   : > { %v3495_v60 = vstv %s2011_s28  ;;  %v467_v0 = vmax.f32 %v451_v18, 0.0  ;;  %v468_v8 = vmax.f32 %v452_v16, 0.0  ;;  %v469_v36 = vmax.f32 %v453_v54, 0.0  ;;  %s427_s28 = sadd.s32 128, %s3582_s27 }
 0x16a   : > { %vm2239_vm0 = vcmp.lt.s32.totalorder %v2042_v23, %v3495_v60  ;;  %v470_v22 = vmax.f32 %v454_v33, 0.0  ;;  %v471_v47 = vmax.f32 %v455_v63, 0.0  ;;  %v472_v21 = vmax.f32 %v456_v35, 0.0  ;;  %s3584_s28 = smov (!%p1346_p8, %s427_s28), %s3582_s27  ;;  %p1564_p2 = pnand %p1563_p1, %p1557_p5 }
 0x16b   : > { %v473_v52 = vmax.f32 %v457_v50, 0.0  ;;  %v474_v61 = vmax.f32 %v458_v32, 0.0  ;;  %v475_v58 = vmax.f32 %v459_v41, 0.0  ;;  %v476_v56 = vmax.f32 %v460_v25, 0.0  ;;  %s2325_s29 = sand.u32 127, %s3584_s28  }
 0x16c   : > { %v477_v57 = vmax.f32 %v461_v13, 0.0  ;;  %v478_v60 = vmax.f32 %v462_v48, 0.0  ;;  %v479_v23 = vmin.f32 %v463_v7, 1.0  ;;  %v480_v42 = vmin.f32 %v464_v59, 1.0 }
 0x16d   : > { %v481_v40 = vmin.f32 %v465_v29, 1.0  ;;  %v482_v18 = vmin.f32 %v466_v49, 1.0  ;;  %v483_v33 = vmin.f32 %v467_v0, 1.0  ;;  %v484_v16 = vmin.f32 %v468_v8, 1.0 }
 0x16e   : > { %v485_v54 = vmin.f32 %v469_v36, 1.0  ;;  %v486_v63 = vmin.f32 %v470_v22, 1.0  ;;  %v487_v32 = vmin.f32 %v471_v47, 1.0  ;;  %v488_v35 = vmin.f32 %v472_v21, 1.0 }
 0x16f   : > { %v489_v41 = vmin.f32 %v473_v52, 1.0  ;;  %v490_v25 = vmin.f32 %v474_v61, 1.0  ;;  %v491_v13 = vmin.f32 %v475_v58, 1.0  ;;  %v492_v48 = vmin.f32 %v476_v56, 1.0 }
 0x170   : > { %v493_v49 = vmin.f32 %v477_v57, 1.0  ;;  %v494_v50 = vmin.f32 %v478_v60, 1.0  ;;  %v500_v22 = vrot.slane %v479_v23, %v2060_v2  ;;  %v502_v36 = vrot.slane %v480_v42, %v2060_v2 }
 0x171   : > { %v504_v7 = vrot.slane %v481_v40, %v2060_v2  ;;  %v506_v21 = vrot.slane %v482_v18, %v2060_v2  ;;  %v508_v59 = vrot.slane %v483_v33, %v2060_v2  ;;  %v510_v29 = vrot.slane %v484_v16, %v2060_v2 }
 0x172   : > { %v512_v0 = vrot.slane %v485_v54, %v2060_v2  ;;  %v514_v8 = vrot.slane %v486_v63, %v2060_v2  ;;  %v516_v47 = vrot.slane %v487_v32, %v2060_v2  ;;  %v518_v23 = vrot.slane %v488_v35, %v2060_v2 }
 0x173   : > { %v520_v40 = vrot.slane %v489_v41, %v2060_v2  ;;  %v522_v42 = vrot.slane %v490_v25, %v2060_v2  ;;  %v524_v52 = vrot.slane %v491_v13, %v2060_v2  ;;  %v526_v61 = vrot.slane %v492_v48, %v2060_v2 }
 0x174   : > { %v528_v58 = vrot.slane %v493_v49, %v2060_v2  ;;  %v530_v56 = vrot.slane %v494_v50, %v2060_v2  ;;  %v539_v18 = vsel %vm2239_vm0, %v516_v47, %v518_v23  ;;  %v540_v33 = vsel %vm2239_vm0, %v514_v8, %v516_v47 }
 0x175   : > { %v537_v57 = vsel %vm2239_vm0, %v520_v40, %v522_v42  ;;  %v538_v60 = vsel %vm2239_vm0, %v518_v23, %v520_v40  ;;  %v535_v63 = vsel %vm2239_vm0, %v524_v52, %v526_v61  ;;  %v536_v32 = vsel %vm2239_vm0, %v522_v42, %v524_v52 }
 0x176   : > { %v533_v16 = vsel %vm2239_vm0, %v528_v58, %v530_v56  ;;  %v534_v54 = vsel %vm2239_vm0, %v526_v61, %v528_v58  ;;  %v541_v35 = vsel %vm2239_vm0, %v512_v0, %v514_v8  ;;  %v542_v41 = vsel %vm2239_vm0, %v510_v29, %v512_v0 }
 0x177   : > { %v543_v25 = vsel %vm2239_vm0, %v508_v59, %v510_v29  ;;  %v544_v13 = vsel %vm2239_vm0, %v506_v21, %v508_v59  ;;  %v545_v48 = vsel %vm2239_vm0, %v504_v7, %v506_v21  ;;  %v546_v49 = vsel %vm2239_vm0, %v502_v36, %v504_v7 }
 0x178   : > { %v547_v50 = vsel %vm2239_vm0, %v500_v22, %v502_v36  ;;  %v548_v8 = vsel %vm2239_vm0, %v530_v56, %v500_v22  ;;  %v556_v59 = vsel %vm551_vm1, %v545_v48, %v544_v13  ;;  %v558_v21 = vsel %vm551_vm1, %v543_v25, %v542_v41 }
 0x179   : > { %v552_v0 = vsel %vm551_vm1, %v533_v16, %v548_v8  ;;  %v554_v29 = vsel %vm551_vm1, %v547_v50, %v546_v49  ;;  %v560_v7 = vsel %vm551_vm1, %v541_v35, %v540_v33  ;;  %v562_v36 = vsel %vm551_vm1, %v539_v18, %v538_v60 }
 0x17a   : > { %v564_v22 = vsel %vm551_vm1, %v537_v57, %v536_v32  ;;  %v566_v47 = vsel %vm551_vm1, %v535_v63, %v534_v54  ;;  %v575_v40 = vsel %vm570_vm2, %v554_v29, %v556_v59  ;;  %v579_v42 = vsel %vm570_vm2, %v558_v21, %v560_v7 }
 0x17b   : > { %v571_v23 = vsel %vm570_vm2, %v566_v47, %v552_v0  ;;  %v583_v52 = vsel %vm570_vm2, %v562_v36, %v564_v22  ;;  %v598_v58 = vsel %vm3448_vm3, %v575_v40, %v579_v42  ;;  %v553_v56 = vsel %vm551_vm1, %v548_v8, %v547_v50 }
 0x17c   : > { %v590_v61 = vsel %vm3448_vm3, %v583_v52, %v571_v23  ;;  %v555_v26 = vsel %vm551_vm1, %v546_v49, %v545_v48  ;;  %v557_v62 = vsel %vm551_vm1, %v544_v13, %v543_v25  ;;  %v559_v44 = vsel %vm551_vm1, %v542_v41, %v541_v35 }
 0x17d   : > { %v609_v28 = vsel %vm3447_vm4, %v598_v58, %v590_v61  ;;  %v561_v53 = vsel %vm551_vm1, %v540_v33, %v539_v18  ;;  %v563_v43 = vsel %vm551_vm1, %v538_v60, %v537_v57  ;;  %v565_v48 = vsel %vm551_vm1, %v536_v32, %v535_v63 }
 0x17e   : > { %627 = vrot.lane.b32.xlu0 %v609_v28, %s2325_s29  ;;  %v567_v49 = vsel %vm551_vm1, %v534_v54, %v533_v16  ;;  %v576_v25 = vsel %vm570_vm2, %v555_v26, %v557_v62  ;;  %v580_v28 = vsel %vm570_vm2, %v559_v44, %v561_v53  ;;  %v584_v57 = vsel %vm570_vm2, %v563_v43, %v565_v48 }
 0x17f   : > { %v572_v35 = vsel %vm570_vm2, %v567_v49, %v553_v56  ;;  %v617_v60 = vsel %vm3447_vm4, %v590_v61, %v598_v58  ;;  %v2374_v33 = vsel %vm3448_vm3, %v576_v25, %v580_v28  ;;  %v573_v16 = vsel %vm570_vm2, %v552_v0, %v554_v29 }
 0x180   : > { %v2370_v18 = vsel %vm3448_vm3, %v584_v57, %v572_v35  ;;  %v577_v54 = vsel %vm570_vm2, %v556_v59, %v558_v21  ;;  %v581_v32 = vsel %vm570_vm2, %v560_v7, %v562_v36  ;;  %v585_v41 = vsel %vm570_vm2, %v564_v22, %v566_v47 }
 0x181   : > { %v610_v63 = vsel %vm3447_vm4, %v2374_v33, %v2370_v18  ;;  %v2390_v13 = vsel %vm570_vm2, %v553_v56, %v555_v26  ;;  %v592_v50 = vsel %vm3448_vm3, %v585_v41, %v573_v16  ;;  %v600_v8 = vsel %vm3448_vm3, %v577_v54, %v581_v32 }
 0x182   : > { %629 = vrot.lane.b32.xlu1 %v610_v63, %s2325_s29  ;;  %643 = vrot.lane.b32.xlu0 %v617_v60, %s2325_s29  ;;  %v2400_v0 = vsel %vm570_vm2, %v557_v62, %v559_v44  ;;  %v611_v29 = vsel %vm3447_vm4, %v600_v8, %v592_v50  ;;  %v619_v26 = vsel %vm3447_vm4, %v592_v50, %v600_v8 }
 0x183   : > { %v2408_v59 = vsel %vm570_vm2, %v561_v53, %v563_v43  ;;  %v2412_v21 = vsel %vm570_vm2, %v565_v48, %v567_v49  ;;  %v594_v43 = vsel %vm3448_vm3, %v571_v23, %v575_v40  ;;  %v602_v53 = vsel %vm3448_vm3, %v579_v42, %v583_v52 }
 0x184   : > { %v2418_v44 = vsel %vm3448_vm3, %v2412_v21, %v2390_v13  ;;  %v2424_v62 = vsel %vm3448_vm3, %v2400_v0, %v2408_v59  ;;  %v621_v36 = vsel %vm3447_vm4, %v594_v43, %v602_v53  ;;  %v613_v22 = vsel %vm3447_vm4, %v602_v53, %v594_v43 }
 0x185   : > { %v612_v7 = vsel %vm3447_vm4, %v2424_v62, %v2418_v44  ;;  %v2440_v47 = vsel %vm3448_vm3, %v573_v16, %v577_v54  ;;  %v2446_v23 = vsel %vm3448_vm3, %v581_v32, %v585_v41  ;;  %v2450_v40 = vsel %vm3448_vm3, %v572_v35, %v576_v25 }
 0x186   : > { %631 = vrot.lane.b32.xlu1 %v611_v29, %s2325_s29  ;;  %647 = vrot.lane.b32.xlu0 %v619_v26, %s2325_s29  ;;  %v2454_v42 = vsel %vm3448_vm3, %v580_v28, %v584_v57  ;;  %v623_v52 = vsel %vm3447_vm4, %v2440_v47, %v2446_v23  ;;  %v723_v58 = vadd.f32 %v2075_v27, %v2195_v12 }
 0x187   : > { %v614_v61 = vsel %vm3447_vm4, %v2454_v42, %v2450_v40  ;;  %v724_v56 = vadd.f32 %v2079_v37, %v2195_v12  ;;  %v725_v48 = vadd.f32 %v2083_v45, %v2195_v12  ;;  %v726_v49 = vadd.f32 %v2087_v31, %v2195_v12 }
 0x188   : > { %v727_v25 = vadd.f32 %v2091_v30, %v2195_v12  ;;  %v728_v35 = vadd.f32 %v2096_v1, %v2195_v12  ;;  %v729_v28 = vadd.f32 %v2100_v3, %v2195_v12  ;;  %v730_v27 = vadd.f32 %v2104_v6, %v2195_v12 }
 0x189   : > { %v731_v37 = vadd.f32 %v2108_v11, %v2195_v12  ;;  %v732_v45 = vadd.f32 %v2112_v19, %v2195_v12  ;;  %v733_v31 = vadd.f32 %v2116_v20, %v2195_v12  ;;  %v734_v30 = vadd.f32 %v2120_v34, %v2195_v12 }
 0x18a   : > { %633 = vrot.lane.b32.xlu1 %v612_v7, %s2325_s29  ;;  %651 = vrot.lane.b32.xlu0 %v621_v36, %s2325_s29  ;;  %v735_v1 = vadd.f32 %v2124_v38, %v2195_v12  ;;  %v739_v3 = vmax.f32 %v723_v58, 0.0  ;;  %v736_v6 = vadd.f32 %v2132_v46, %v2195_v12  ;;  %v737_v11 = vadd.f32 %v2136_v55, %v2195_v12 }
 0x18b   : > { %v738_v19 = vadd.f32 %v2140_v5, %v2195_v12  ;;  %v740_v57 = vmax.f32 %v724_v56, 0.0  ;;  %v741_v20 = vmax.f32 %v725_v48, 0.0  ;;  %v742_v60 = vmax.f32 %v726_v49, 0.0 }
 0x18c   : > { %v743_v16 = vmax.f32 %v727_v25, 0.0  ;;  %v744_v54 = vmax.f32 %v728_v35, 0.0  ;;  %v745_v34 = vmax.f32 %v729_v28, 0.0  ;;  %v746_v63 = vmax.f32 %v730_v27, 0.0 }
 0x18d   : > { %v747_v32 = vmax.f32 %v731_v37, 0.0  ;;  %v748_v41 = vmax.f32 %v732_v45, 0.0  ;;  %v749_v38 = vmax.f32 %v733_v31, 0.0  ;;  %v750_v46 = vmax.f32 %v734_v30, 0.0 }
 0x18e   : > { %635 = vrot.lane.b32.xlu1 %v613_v22, %s2325_s29  ;;  %655 = vrot.lane.b32.xlu0 %v623_v52, %s2325_s29  ;;  %v751_v50 = vmax.f32 %v735_v1, 0.0  ;;  %v752_v8 = vmax.f32 %v736_v6, 0.0  ;;  %v753_v55 = vmax.f32 %v737_v11, 0.0  ;;  %v754_v29 = vmax.f32 %v738_v19, 0.0 }
 0x18f   : > { %v755_v26 = vmin.f32 %v739_v3, 1.0  ;;  %v756_v5 = vmin.f32 %v740_v57, 1.0  ;;  %v757_v43 = vmin.f32 %v741_v20, 1.0  ;;  %v758_v53 = vmin.f32 %v742_v60, 1.0 }
 0x190   : > { %v759_v7 = vmin.f32 %v743_v16, 1.0  ;;  %v760_v36 = vmin.f32 %v744_v54, 1.0  ;;  %v761_v58 = vmin.f32 %v745_v34, 1.0  ;;  %v762_v56 = vmin.f32 %v746_v63, 1.0 }
 0x191   : > { %v763_v48 = vmin.f32 %v747_v32, 1.0  ;;  %v764_v49 = vmin.f32 %v748_v41, 1.0  ;;  %v765_v22 = vmin.f32 %v749_v38, 1.0  ;;  %v766_v52 = vmin.f32 %v750_v46, 1.0 }
 0x192   : > { %637 = vrot.lane.b32.xlu1 %v614_v61, %s2325_s29  ;;  %v767_v25 = vmin.f32 %v751_v50, 1.0  ;;  %v768_v35 = vmin.f32 %v752_v8, 1.0  ;;  %v769_v28 = vmin.f32 %v753_v55, 1.0  ;;  %v770_v27 = vmin.f32 %v754_v29, 1.0 }
 0x193   : > { %v772_v37 = vrot.slane %v755_v26, %v2060_v2  ;;  %v774_v45 = vrot.slane %v756_v5, %v2060_v2  ;;  %v776_v31 = vrot.slane %v757_v43, %v2060_v2  ;;  %v778_v30 = vrot.slane %v758_v53, %v2060_v2 }
 0x194   : > { %v780_v1 = vrot.slane %v759_v7, %v2060_v2  ;;  %v782_v3 = vrot.slane %v760_v36, %v2060_v2  ;;  %v784_v61 = vrot.slane %v761_v58, %v2060_v2  ;;  %v786_v6 = vrot.slane %v762_v56, %v2060_v2 }
 0x195   : > { %v788_v11 = vrot.slane %v763_v48, %v2060_v2  ;;  %v790_v19 = vrot.slane %v764_v49, %v2060_v2  ;;  %v792_v57 = vrot.slane %v765_v22, %v2060_v2  ;;  %v794_v20 = vrot.slane %v766_v52, %v2060_v2 }
 0x196   : > { %v796_v60 = vrot.slane %v767_v25, %v2060_v2  ;;  %v798_v16 = vrot.slane %v768_v35, %v2060_v2  ;;  %v800_v54 = vrot.slane %v769_v28, %v2060_v2  ;;  %v802_v34 = vrot.slane %v770_v27, %v2060_v2 }
 0x197   : > { %v2519_v63 = vsel %vm2239_vm0, %v788_v11, %v790_v19  ;;  %v2523_v32 = vsel %vm2239_vm0, %v786_v6, %v788_v11  ;;  %v807_v46 = vsel %vm2239_vm0, %v792_v57, %v794_v20  ;;  %v808_v50 = vsel %vm2239_vm0, %v790_v19, %v792_v57 }
 0x198   : > { %v2527_v41 = vsel %vm2239_vm0, %v796_v60, %v798_v16  ;;  %v2531_v38 = vsel %vm2239_vm0, %v794_v20, %v796_v60  ;;  %v803_v8 = vsel %vm2239_vm0, %v800_v54, %v802_v34  ;;  %v804_v55 = vsel %vm2239_vm0, %v798_v16, %v800_v54 }
 0x199   : > { %v811_v29 = vsel %vm2239_vm0, %v784_v61, %v786_v6  ;;  %v812_v26 = vsel %vm2239_vm0, %v782_v3, %v784_v61  ;;  %v813_v5 = vsel %vm2239_vm0, %v780_v1, %v782_v3  ;;  %v814_v43 = vsel %vm2239_vm0, %v778_v30, %v780_v1 }
 0x19a   : > { %v815_v53 = vsel %vm2239_vm0, %v776_v31, %v778_v30  ;;  %v816_v7 = vsel %vm2239_vm0, %v774_v45, %v776_v31  ;;  %v817_v36 = vsel %vm2239_vm0, %v772_v37, %v774_v45  ;;  %v818_v58 = vsel %vm2239_vm0, %v802_v34, %v772_v37 }
 0x19b   : > { %v823_v56 = vsel %vm551_vm1, %v815_v53, %v814_v43  ;;  %v825_v48 = vsel %vm551_vm1, %v813_v5, %v812_v26  ;;  %v819_v49 = vsel %vm551_vm1, %v803_v8, %v818_v58  ;;  %v821_v22 = vsel %vm551_vm1, %v817_v36, %v816_v7 }
 0x19c   : > { %v827_v52 = vsel %vm551_vm1, %v811_v29, %v2523_v32  ;;  %v829_v25 = vsel %vm551_vm1, %v2519_v63, %v808_v50  ;;  %v831_v35 = vsel %vm551_vm1, %v807_v46, %v2531_v38  ;;  %v833_v28 = vsel %vm551_vm1, %v2527_v41, %v804_v55 }
 0x19d   : > { %v839_v27 = vsel %vm570_vm2, %v821_v22, %v823_v56  ;;  %v843_v37 = vsel %vm570_vm2, %v825_v48, %v827_v52  ;;  %v835_v45 = vsel %vm570_vm2, %v833_v28, %v819_v49  ;;  %v847_v31 = vsel %vm570_vm2, %v829_v25, %v831_v35 }
 0x19e   : > { %v859_v30 = vsel %vm3448_vm3, %v839_v27, %v843_v37  ;;  %v615_v1 = vsel %vm3447_vm4, %v2446_v23, %v2440_v47  ;;  %v851_v3 = vsel %vm3448_vm3, %v847_v31, %v835_v45  ;;  %v837_v61 = vsel %vm570_vm2, %v819_v49, %v821_v22 }
 0x19f   : > { %639 = vrot.lane.b32.xlu1 %v615_v1, %s2325_s29  ;;  %v841_v6 = vsel %vm570_vm2, %v823_v56, %v825_v48  ;;  %v845_v11 = vsel %vm570_vm2, %v827_v52, %v829_v25  ;;  %v867_v19 = vsel %vm3447_vm4, %v859_v30, %v851_v3  ;;  %v849_v47 = vsel %vm570_vm2, %v831_v35, %v833_v28  ;;  %v3498_v1 = vld [vmem:[#allocation14_spill] sm:$0xff] }
 0x1a0   : > { %v861_v23 = vsel %vm3448_vm3, %v841_v6, %v845_v11  ;;  %v597_v57 = vsel %vm3448_vm3, %v2390_v13, %v2400_v0  ;;  %883 = vrot.lane.b32.xlu0 %v867_v19, %s2325_s29  ;;  %v853_v20 = vsel %vm3448_vm3, %v849_v47, %v837_v61  ;;  %v605_v60 = vsel %vm3448_vm3, %v2408_v59, %v2412_v21  ;;  %v3501_v19 = vld [vmem:[#allocation17_spill] sm:$0xff] }
 0x1a1   : > { %v855_v16 = vsel %vm3448_vm3, %v835_v45, %v839_v27  ;;  %v863_v54 = vsel %vm3448_vm3, %v843_v37, %v847_v31  ;;  %v869_v34 = vsel %vm3447_vm4, %v861_v23, %v853_v20  ;;  %v616_v13 = vsel %vm3447_vm4, %v605_v60, %v597_v57 }
 0x1a2   : > { %v871_v0 = vsel %vm3447_vm4, %v863_v54, %v855_v16  ;;  %v618_v59 = vsel %vm3447_vm4, %v2370_v18, %v2374_v33  ;;  %v857_v21 = vsel %vm3448_vm3, %v837_v61, %v841_v6  ;;  %v865_v56 = vsel %vm3448_vm3, %v845_v11, %v849_v47  ;;  %v3500_v6 = vld [vmem:[#allocation16_spill] sm:$0xff] }
 0x1a3   : > { %641 = vrot.lane.b32.xlu1 %v616_v13, %s2325_s29  ;;  %v620_v48 = vsel %vm3447_vm4, %v2418_v44, %v2424_v62  ;;  %v875_v49 = vsel %vm3447_vm4, %v851_v3, %v859_v30  ;;  %v873_v22 = vsel %vm3447_vm4, %v865_v56, %v857_v21  ;;  %v622_v18 = vsel %vm3447_vm4, %v2450_v40, %v2454_v42  ;;  %v3499_v3 = vld [vmem:[#allocation15_spill] sm:$0xff] }
 0x1a4   : > { %v2650_v33 = vsel %vm3447_vm4, %v853_v20, %v861_v23  ;;  %v2654_v52 = vsel %vm3447_vm4, %v597_v57, %v605_v60  ;;  %887 = vrot.lane.b32.xlu0 %v869_v34, %s2325_s29  ;;  %v2659_v44 = vsel %vm3447_vm4, %v855_v16, %v863_v54  ;;  %v820_v62 = vsel %vm551_vm1, %v818_v58, %v817_v36  ;;  %v3505_v60 = vld [vmem:[#allocation21_spill] sm:$0xff]  ;;  %v3506_v54 = vld [vmem:[#allocation22_spill] sm:$0xff]  ;;  %v3507_v13 = vld [vmem:[#allocation23_spill] sm:$0xff] }
 0x1a5   : > { %v822_v40 = vsel %vm551_vm1, %v816_v7, %v815_v53  ;;  %v824_v42 = vsel %vm551_vm1, %v814_v43, %v813_v5  ;;  %v826_v25 = vsel %vm551_vm1, %v812_v26, %v811_v29  ;;  %v828_v35 = vsel %vm551_vm1, %v2523_v32, %v2519_v63 }
 0x1a6   : > { %v830_v28 = vsel %vm551_vm1, %v808_v50, %v807_v46  ;;  %v832_v36 = vsel %vm551_vm1, %v2531_v38, %v2527_v41  ;;  %v834_v5 = vsel %vm551_vm1, %v804_v55, %v803_v8  ;;  %v2684_v29 = vsel %vm570_vm2, %v822_v40, %v824_v42 }
 0x1a7   : > { %645 = vrot.lane.b32.xlu1 %v618_v59, %s2325_s29  ;;  %v2688_v63 = vsel %vm570_vm2, %v826_v25, %v828_v35  ;;  %v2692_v32 = vsel %vm570_vm2, %v830_v28, %v832_v36  ;;  %v2696_v41 = vsel %vm570_vm2, %v834_v5, %v820_v62  ;;  %v2706_v46 = vsel %vm3447_vm4, %v857_v21, %v865_v56  ;;  %v3508_v59 = vld [vmem:[#allocation24_spill] sm:$0xff]  ;;  %v3509_v56 = vld [vmem:[#allocation27_spill] sm:$0xff] }
 0x1a8   : > { %v2702_v38 = vsel %vm3448_vm3, %v2684_v29, %v2688_v63  ;;  %v2710_v50 = vsel %vm570_vm2, %v820_v62, %v822_v40  ;;  %891 = vrot.lane.b32.xlu0 %v871_v0, %s2325_s29  ;;  %v2717_v8 = vsel %vm3448_vm3, %v2692_v32, %v2696_v41  ;;  %v2721_v55 = vsel %vm570_vm2, %v824_v42, %v826_v25 }
 0x1a9   : > { %v2725_v26 = vsel %vm570_vm2, %v828_v35, %v830_v28  ;;  %v2729_v43 = vsel %vm570_vm2, %v832_v36, %v834_v5  ;;  %v868_v53 = vsel %vm3447_vm4, %v2702_v38, %v2717_v8  ;;  %v980_v27 = vadd.f32 %v2144_v24, %v2195_v12 }
 0x1aa   : > { %v2739_v7 = vsel %vm3448_vm3, %v2729_v43, %v2710_v50  ;;  %v2745_v58 = vsel %vm3448_vm3, %v2721_v55, %v2725_v26  ;;  %v981_v45 = vadd.f32 %v2148_v39, %v2195_v12  ;;  %v982_v31 = vadd.f32 %v2152_v51, %v2195_v12  ;;  %v3502_v39 = vld [vmem:[#allocation18_spill] sm:$0xff]  ;;  %v3503_v51 = vld [vmem:[#allocation19_spill] sm:$0xff] }
 0x1ab   : > { %649 = vrot.lane.b32.xlu1 %v620_v48, %s2325_s29  ;;  %v2754_v37 = vsel %vm3447_vm4, %v2745_v58, %v2739_v7  ;;  %v983_v30 = vadd.f32 %v2156_v9, %v2195_v12  ;;  %v984_v24 = vadd.f32 %v3498_v1, %v2195_v12  ;;  %v985_v61 = vadd.f32 %v3499_v3, %v2195_v12  ;;  %v3504_v9 = vld [vmem:[#allocation20_spill] sm:$0xff] }
 0x1ac   : > { %v986_v11 = vadd.f32 %v3500_v6, %v2195_v12  ;;  %v987_v47 = vadd.f32 %v3501_v19, %v2195_v12  ;;  %895 = vrot.lane.b32.xlu0 %v873_v22, %s2325_s29  ;;  %v988_v23 = vadd.f32 %v3502_v39, %v2195_v12  ;;  %v989_v57 = vadd.f32 %v3503_v51, %v2195_v12 }
 0x1ad   : > { %v990_v20 = vadd.f32 %v3504_v9, %v2195_v12  ;;  %v991_v16 = vadd.f32 %v3505_v60, %v2195_v12  ;;  %v992_v34 = vadd.f32 %v3506_v54, %v2195_v12  ;;  %v993_v0 = vadd.f32 %v3507_v13, %v2195_v12 }
 0x1ae   : > { %v994_v21 = vadd.f32 %v3508_v59, %v2195_v12  ;;  %v995_v48 = vadd.f32 %v3509_v56, %v2195_v12  ;;  %v996_v22 = vmax.f32 %v980_v27, 0.0  ;;  %v997_v62 = vmax.f32 %v981_v45, 0.0 }
 0x1af   : > { %653 = vrot.lane.b32.xlu1 %v622_v18, %s2325_s29  ;;  %v998_v40 = vmax.f32 %v982_v31, 0.0  ;;  %v999_v42 = vmax.f32 %v983_v30, 0.0  ;;  %v1000_v25 = vmax.f32 %v984_v24, 0.0  ;;  %v1001_v35 = vmax.f32 %v985_v61, 0.0 }
 0x1b0   : > { %v1002_v28 = vmax.f32 %v986_v11, 0.0  ;;  %v1003_v36 = vmax.f32 %v987_v47, 0.0  ;;  %899 = vrot.lane.b32.xlu0 %v875_v49, %s2325_s29  ;;  %v1004_v5 = vmax.f32 %v988_v23, 0.0  ;;  %v1005_v1 = vmax.f32 %v989_v57, 0.0 }
 0x1b1   : > { %v1006_v3 = vmax.f32 %v990_v20, 0.0  ;;  %v1007_v6 = vmax.f32 %v991_v16, 0.0  ;;  %v1008_v19 = vmax.f32 %v992_v34, 0.0  ;;  %v1009_v39 = vmax.f32 %v993_v0, 0.0 }
 0x1b2   : > { %v1010_v51 = vmax.f32 %v994_v21, 0.0  ;;  %v1011_v12 = vmax.f32 %v995_v48, 0.0  ;;  %v1012_v18 = vmin.f32 %v996_v22, 1.0  ;;  %v1013_v27 = vmin.f32 %v997_v62, 1.0 }
 0x1b3   : > { %657 = vrot.lane.b32.xlu1 %v2654_v52, %s2325_s29  ;;  %v1014_v45 = vmin.f32 %v998_v40, 1.0  ;;  %v1015_v31 = vmin.f32 %v999_v42, 1.0  ;;  %v1016_v30 = vmin.f32 %v1000_v25, 1.0  ;;  %v1017_v24 = vmin.f32 %v1001_v35, 1.0 }
 0x1b4   : > { %v1018_v61 = vmin.f32 %v1002_v28, 1.0  ;;  %v1019_v49 = vmin.f32 %v1003_v36, 1.0  ;;  %903 = vrot.lane.b32.xlu0 %v2650_v33, %s2325_s29  ;;  %v1020_v11 = vmin.f32 %v1004_v5, 1.0  ;;  %v1021_v47 = vmin.f32 %v1005_v1, 1.0 }
 0x1b5   : > { %v1022_v23 = vmin.f32 %v1006_v3, 1.0  ;;  %v1023_v57 = vmin.f32 %v1007_v6, 1.0  ;;  %v1024_v9 = vmin.f32 %v1008_v19, 1.0  ;;  %v1025_v20 = vmin.f32 %v1009_v39, 1.0 }
 0x1b6   : > { %v1026_v60 = vmin.f32 %v1010_v51, 1.0  ;;  %v1027_v52 = vmin.f32 %v1011_v12, 1.0  ;;  %v1029_v16 = vrot.slane %v1012_v18, %v2060_v2  ;;  %v1031_v54 = vrot.slane %v1013_v27, %v2060_v2 }
 0x1b7   : > { %885 = vrot.lane.b32.xlu1 %v868_v53, %s2325_s29  ;;  %v1033_v34 = vrot.slane %v1014_v45, %v2060_v2  ;;  %v1035_v13 = vrot.slane %v1015_v31, %v2060_v2  ;;  %v1037_v33 = vrot.slane %v1016_v30, %v2060_v2  ;;  %v1039_v0 = vrot.slane %v1017_v24, %v2060_v2 }
 0x1b8   : > { %v1041_v59 = vrot.slane %v1018_v61, %v2060_v2  ;;  %v1043_v21 = vrot.slane %v1019_v49, %v2060_v2  ;;  %907 = vrot.lane.b32.xlu0 %v2659_v44, %s2325_s29  ;;  %v1045_v53 = vrot.slane %v1020_v11, %v2060_v2  ;;  %v1047_v56 = vrot.slane %v1021_v47, %v2060_v2 }
 0x1b9   : > { %v1049_v48 = vrot.slane %v1022_v23, %v2060_v2  ;;  %v1051_v22 = vrot.slane %v1023_v57, %v2060_v2  ;;  %v1053_v62 = vrot.slane %v1024_v9, %v2060_v2  ;;  %v1055_v40 = vrot.slane %v1025_v20, %v2060_v2 }
 0x1ba   : > { %v1057_v42 = vrot.slane %v1026_v60, %v2060_v2  ;;  %v1059_v25 = vrot.slane %v1027_v52, %v2060_v2  ;;  %v1066_v28 = vsel %vm2239_vm0, %v1045_v53, %v1047_v56  ;;  %v1067_v36 = vsel %vm2239_vm0, %v1043_v21, %v1045_v53 }
 0x1bb   : > { %889 = vrot.lane.b32.xlu1 %v2754_v37, %s2325_s29  ;;  %v1064_v44 = vsel %vm2239_vm0, %v1049_v48, %v1051_v22  ;;  %v1065_v35 = vsel %vm2239_vm0, %v1047_v56, %v1049_v48  ;;  %v1062_v37 = vsel %vm2239_vm0, %v1053_v62, %v1055_v40  ;;  %v1063_v1 = vsel %vm2239_vm0, %v1051_v22, %v1053_v62 }
 0x1bc   : > { %v1060_v5 = vsel %vm2239_vm0, %v1057_v42, %v1059_v25  ;;  %v1061_v2 = vsel %vm2239_vm0, %v1055_v40, %v1057_v42  ;;  %911 = vrot.lane.b32.xlu0 %v2706_v46, %s2325_s29  ;;  %v1068_v3 = vsel %vm2239_vm0, %v1041_v59, %v1043_v21  ;;  %v1069_v6 = vsel %vm2239_vm0, %v1039_v0, %v1041_v59 }
 0x1bd   : > { %v1070_v19 = vsel %vm2239_vm0, %v1037_v33, %v1039_v0  ;;  %v1071_v39 = vsel %vm2239_vm0, %v1035_v13, %v1037_v33  ;;  %v1072_v51 = vsel %vm2239_vm0, %v1033_v34, %v1035_v13  ;;  %v1073_v12 = vsel %vm2239_vm0, %v1031_v54, %v1033_v34 }
 0x1be   : > { %v1074_v46 = vsel %vm2239_vm0, %v1029_v16, %v1031_v54  ;;  %v1075_v18 = vsel %vm2239_vm0, %v1059_v25, %v1029_v16  ;;  %v1080_v31 = vsel %vm551_vm1, %v1072_v51, %v1071_v39  ;;  %v1082_v30 = vsel %vm551_vm1, %v1070_v19, %v1069_v6 }
 0x1bf   : > { %v1076_v27 = vsel %vm551_vm1, %v1060_v5, %v1075_v18  ;;  %v1078_v45 = vsel %vm551_vm1, %v1074_v46, %v1073_v12  ;;  %v1084_v24 = vsel %vm551_vm1, %v1068_v3, %v1067_v36  ;;  %v1086_v10 = vsel %vm551_vm1, %v1066_v28, %v1065_v35 }
 0x1c0   : > { %v1088_v61 = vsel %vm551_vm1, %v1064_v44, %v1063_v1  ;;  %v1090_v49 = vsel %vm551_vm1, %v1062_v37, %v1061_v2  ;;  %v1096_v47 = vsel %vm570_vm2, %v1078_v45, %v1080_v31  ;;  %v1100_v23 = vsel %vm570_vm2, %v1082_v30, %v1084_v24 }
 0x1c1   : > { %v1092_v11 = vsel %vm570_vm2, %v1090_v49, %v1076_v27  ;;  %v1104_v57 = vsel %vm570_vm2, %v1086_v10, %v1088_v61  ;;  %v1116_v20 = vsel %vm3448_vm3, %v1096_v47, %v1100_v23  ;;  %v856_v60 = vsel %vm3448_vm3, %v2696_v41, %v2684_v29 }
 0x1c2   : > { %v1108_v9 = vsel %vm3448_vm3, %v1104_v57, %v1092_v11  ;;  %v864_v52 = vsel %vm3448_vm3, %v2688_v63, %v2692_v32  ;;  %v1094_v34 = vsel %vm570_vm2, %v1076_v27, %v1078_v45  ;;  %v1098_v13 = vsel %vm570_vm2, %v1080_v31, %v1082_v30 }
 0x1c3   : > { %v1124_v16 = vsel %vm3447_vm4, %v1116_v20, %v1108_v9  ;;  %v872_v54 = vsel %vm3447_vm4, %v864_v52, %v856_v60  ;;  %v1102_v29 = vsel %vm570_vm2, %v1084_v24, %v1086_v10  ;;  %v1106_v63 = vsel %vm570_vm2, %v1088_v61, %v1090_v49 }
 0x1c4   : > { %1140 = vrot.lane.b32.xlu0 %v1124_v16, %s2325_s29  ;;  %893 = vrot.lane.b32.xlu1 %v872_v54, %s2325_s29  ;;  %v858_v32 = vsel %vm3448_vm3, %v2710_v50, %v2721_v55  ;;  %v1110_v41 = vsel %vm3448_vm3, %v1106_v63, %v1094_v34  ;;  %v1118_v33 = vsel %vm3448_vm3, %v1098_v13, %v1102_v29 }
 0x1c5   : > { %v866_v0 = vsel %vm3448_vm3, %v2725_v26, %v2729_v43  ;;  %v2912_v59 = vsel %vm3448_vm3, %v1092_v11, %v1096_v47  ;;  %v2916_v21 = vsel %vm3448_vm3, %v1100_v23, %v1104_v57  ;;  %v1126_v50 = vsel %vm3447_vm4, %v1118_v33, %v1110_v41 }
 0x1c6   : > { %v874_v55 = vsel %vm3447_vm4, %v866_v0, %v858_v32  ;;  %v1128_v26 = vsel %vm3447_vm4, %v2916_v21, %v2912_v59  ;;  %v876_v43 = vsel %vm3447_vm4, %v2717_v8, %v2702_v38  ;;  %v1077_v53 = vsel %vm551_vm1, %v1075_v18, %v1074_v46 }
 0x1c7   : > { %v1079_v56 = vsel %vm551_vm1, %v1073_v12, %v1072_v51  ;;  %v1081_v48 = vsel %vm551_vm1, %v1071_v39, %v1070_v19  ;;  %v1083_v22 = vsel %vm551_vm1, %v1069_v6, %v1068_v3  ;;  %v1085_v62 = vsel %vm551_vm1, %v1067_v36, %v1066_v28  ;;  %v3511_v51 = vld [vmem:[#allocation25_spill] sm:$0xff] }
 0x1c8   : > { %1144 = vrot.lane.b32.xlu0 %v1126_v50, %s2325_s29  ;;  %897 = vrot.lane.b32.xlu1 %v874_v55, %s2325_s29  ;;  %v1087_v40 = vsel %vm551_vm1, %v1065_v35, %v1064_v44  ;;  %v2947_v38 = vsel %vm551_vm1, %v1063_v1, %v1062_v37  ;;  %v2951_v8 = vsel %vm551_vm1, %v1061_v2, %v1060_v5  ;;  %v2963_v44 = vstv %s1339_s9  ;;  %v3510_v35 = vld [vmem:[#allocation26_spill] sm:$0xff] }
 0x1c9   : > { %v2957_v42 = vsel %vm3448_vm3, %v1094_v34, %v1098_v13  ;;  %v2961_v25 = vsel %vm3448_vm3, %v1102_v29, %v1106_v63  ;;  %v157_v28 = vadd.s32 8, %v3510_v35  ;;  %v164_v4 = vadd.s32 64, %v3510_v35 }
 0x1ca   : > { %v158_v36 = vadd.s32 16, %v3510_v35  ;;  %v2971_v5 = vsel %vm570_vm2, %v2951_v8, %v1077_v53  ;;  %v2975_v2 = vsel %vm570_vm2, %v1079_v56, %v1081_v48  ;;  %v2979_v37 = vsel %vm570_vm2, %v1083_v22, %v1085_v62 }
 0x1cb   : > { %v2984_v1 = vsel %vm570_vm2, %v1087_v40, %v2947_v38  ;;  %v1130_v3 = vsel %vm3447_vm4, %v2961_v25, %v2957_v42  ;;  %v878_v6 = vsel %vm3447_vm4, %v2739_v7, %v2745_v58  ;;  %v166_v19 = vadd.s32 80, %v3510_v35 }
 0x1cc   : > { %1148 = vrot.lane.b32.xlu0 %v1128_v26, %s2325_s29  ;;  %901 = vrot.lane.b32.xlu1 %v876_v43, %s2325_s29  ;;  %v159_v39 = vadd.s32 24, %v3510_v35  ;;  %vm386_vm5 = vcmp.lt.u32.totalorder %v3511_v51, 128  ;;  %v1132_v12 = vsel %vm3447_vm4, %v1108_v9, %v1116_v20  ;;  %v880_v46 = vsel %vm3447_vm4, %v856_v60, %v864_v52 }
 0x1cd   : > { %v168_v18 = vadd.s32 96, %v3510_v35  ;;  %v1134_v7 = vsel %vm3447_vm4, %v1110_v41, %v1118_v33  ;;  %v882_v58 = vsel %vm3447_vm4, %v858_v32, %v866_v0  ;;  %v3012_v27 = vsel %vm3448_vm3, %v2984_v1, %v2971_v5 }
 0x1ce   : > { %v3018_v45 = vsel %vm3448_vm3, %v2975_v2, %v2979_v37  ;;  %v3022_v31 = vsel %vm570_vm2, %v1077_v53, %v1079_v56  ;;  %v3026_v30 = vsel %vm570_vm2, %v1081_v48, %v1083_v22  ;;  %v352_v24 = vadd.s32 %v2963_v44, %v3510_v35 }
 0x1cf   : > { %v353_v10 = vadd.s32 %v2963_v44, %v157_v28  ;;  %v360_v61 = vadd.s32 %v2963_v44, %v164_v4  ;;  %v354_v49 = vadd.s32 %v2963_v44, %v158_v36  ;;  %v362_v11 = vadd.s32 %v2963_v44, %v166_v19 }
 0x1d0   : > { %1152 = vrot.lane.b32.xlu0 %v1130_v3, %s2325_s29  ;;  %905 = vrot.lane.b32.xlu1 %v878_v6, %s2325_s29  ;;  %v355_v47 = vadd.s32 %v2963_v44, %v159_v39  ;;  %vm368_vm6 = vcmp.lt.u32.totalorder %v352_v24, 128  ;;  %v364_v23 = vadd.s32 %v2963_v44, %v168_v18  ;;  %v160_v57 = vadd.s32 32, %v3510_v35 }
 0x1d1   : > { %vm369_vm7 = vcmp.lt.u32.totalorder %v353_v10, 128  ;;  %v3041_v9 = vsel %vm570_vm2, %v1085_v62, %v1087_v40  ;;  %vm3045_vm8 = vmand %vm368_vm6, %vm386_vm5  ;;  %vm376_vm9 = vcmp.lt.u32.totalorder %v360_v61, 128  ;;  %vm370_vm10 = vcmp.lt.u32.totalorder %v354_v49, 128 }
 0x1d2   : > { %vm378_vm11 = vcmp.lt.u32.totalorder %v362_v11, 128  ;;  %vm3051_vm12 = vmand %vm369_vm7, %vm386_vm5  ;;  %vm371_vm13 = vcmp.lt.u32.totalorder %v355_v47, 128  ;;  %v356_v52 = vadd.s32 %v2963_v44, %v160_v57  ;;  %v170_v16 = vadd.s32 112, %v3510_v35 }
 0x1d3   : > { %v161_v54 = vadd.s32 40, %v3510_v35  ;;  %vm3060_vm14 = vmand %vm376_vm9, %vm386_vm5  ;;  %v162_v13 = vadd.s32 48, %v3510_v35  ;;  %v163_v29 = vadd.s32 56, %v3510_v35  ;;  %v165_v63 = vadd.s32 72, %v3510_v35 }
 0x1d4   : > { %1156 = vrot.lane.b32.xlu0 %v1132_v12, %s2325_s29  ;;  %909 = vrot.lane.b32.xlu1 %v880_v46, %s2325_s29  ;;  %v167_v32 = vadd.s32 88, %v3510_v35  ;;  %vm3072_vm15 = vmand %vm370_vm10, %vm386_vm5  ;;  %vm380_vm0 = vcmp.lt.u32.totalorder %v364_v23, 128  ;;  %v366_v33 = vadd.s32 %v2963_v44, %v170_v16  ;;  %v169_v50 = vadd.s32 104, %v3510_v35 }
 0x1d5   : > { %v357_v0 = vadd.s32 %v2963_v44, %v161_v54  ;;  %v1107_v55 = vsel %vm570_vm2, %v2947_v38, %v2951_v8  ;;  %vm3086_vm1 = vmand %vm378_vm11, %vm386_vm5  ;;  %vm372_vm6 = vcmp.lt.u32.totalorder %v356_v52, 128  ;;  %v358_v43 = vadd.s32 %v2963_v44, %v162_v13 }
 0x1d6   : > { %v359_v53 = vadd.s32 %v2963_v44, %v163_v29  ;;  %vm3095_vm7 = vmand %vm371_vm13, %vm386_vm5  ;;  %vm382_vm2 = vcmp.lt.u32.totalorder %v366_v33, 128  ;;  %v361_v17 = vadd.s32 %v2963_v44, %v165_v63  ;;  %v171_v48 = vadd.s32 120, %v3510_v35 }
 0x1d7   : > { %v1136_v22 = vsel %vm3447_vm4, %v2912_v59, %v2916_v21  ;;  %v1125_v62 = vsel %vm3447_vm4, %v3018_v45, %v3012_v27  ;;  %vm3112_vm9 = vmand %vm380_vm0, %vm386_vm5  ;;  %v3524_v40 = vmov 0  ;;  %vm373_vm10 = vcmp.lt.u32.totalorder %v357_v0, 128 }
 0x1d8   : > { %1160 = vrot.lane.b32.xlu0 %v1134_v7, %s2325_s29  ;;  %913 = vrot.lane.b32.xlu1 %v882_v58, %s2325_s29  ;;  %v3525_v40 = vsel %vm3112_vm9, 4294967295, %v3524_v40  ;;  %v363_v38 = vadd.s32 %v2963_v44, %v167_v32  ;;  %v1111_v59 = vsel %vm3448_vm3, %v1107_v55, %v3022_v31  ;;  %v1119_v21 = vsel %vm3448_vm3, %v3026_v30, %v3041_v9  ;;  %vm3129_vm11 = vmand %vm372_vm6, %vm386_vm5 }
 0x1d9   : > { %v3526_v8 = vmov 0  ;;  %vm374_vm13 = vcmp.lt.u32.totalorder %v358_v43, 128  ;;  %v365_v35 = vadd.s32 %v2963_v44, %v169_v50  ;;  %vm3137_vm0 = vmand %vm382_vm2, %vm386_vm5  ;;  %v3528_v28 = vmov 0 }
 0x1da   : > { %v3527_v8 = vsel %vm3129_vm11, 4294967295, %v3526_v8  ;;  %v3529_v28 = vsel %vm3137_vm0, 4294967295, %v3528_v28  ;;  %vm375_vm4 = vcmp.lt.u32.totalorder %v359_v53, 128  ;;  %v367_v4 = vadd.s32 %v2963_v44, %v171_v48  ;;  %vm3144_vm3 = vmand %vm373_vm10, %vm386_vm5 }
 0x1db   : > { %v3530_v36 = vmov 0  ;;  %vm377_vm6 = vcmp.lt.u32.totalorder %v361_v17, 128  ;;  %vm3532_vm11 = vcmp.ne.s32.totalorder %v2071_v15, 0  ;;  %vm3156_vm0 = vmand %vm374_vm13, %vm386_vm5  ;;  %v3534_v44 = vmov 0 }
 0x1dc   : > { %1164 = vrot.lane.b32.xlu0 %v1136_v22, %s2325_s29  ;;  %1142 = vrot.lane.b32.xlu1 %v1125_v62, %s2325_s29  ;;  %v3531_v36 = vsel %vm3144_vm3, 4294967295, %v3530_v36  ;;  %v1138_v3 = vsel %vm3532_vm11, %v2957_v42, %v2961_v25  ;;  %vm3533_vm2 = vmmov %vm3532_vm11  ;;  %v3535_v44 = vsel %vm3156_vm0, 4294967295, %v3534_v44  ;;  %vm379_vm10 = vcmp.lt.u32.totalorder %v363_v38, 128 }
 0x1dd   : > { %v1127_v6 = vsel %vm3533_vm2, %v1119_v21, %v1111_v59  ;;  %vm3536_vm3 = vcmp.ne.s32.totalorder %v2069_v14, 0  ;;  %vm3172_vm13 = vmand %vm375_vm4, %vm386_vm5  ;;  %vm381_vm2 = vcmp.lt.u32.totalorder %v365_v35, 128  ;;  %vm3544_vm4 = vcmp.ne.s32.totalorder %v2071_v15, 0 }
 0x1de   : > { %v1113_v19 = vsel %vm3536_vm3, %v2971_v5, %v2975_v2  ;;  %vm3537_vm11 = vmmov %vm3536_vm3  ;;  %vm383_vm3 = vcmp.lt.u32.totalorder %v367_v4, 128 }
 0x1df   : > { %v1121_v42 = vsel %vm3537_vm11, %v2979_v37, %v2984_v1  ;;  %vm3178_vm0 = vmand %vm377_vm6, %vm386_vm5  ;;  %v3545_v37 = vmov 0  ;;  %vm3547_vm6 = vcmp.ne.s32.totalorder %v2069_v14, 0 }
 0x1e0   : > { %1168 = vrot.lane.b32.xlu0 %v1138_v3, %s2325_s29  ;;  %1146 = vrot.lane.b32.xlu1 %v1127_v6, %s2325_s29  ;;  %vm3184_vm9 = vmand %vm379_vm10, %vm386_vm5  ;;  %v1129_v2 = vsel %vm3544_vm4, %v1121_v42, %v1113_v19  ;;  %v1115_v1 = vsel %vm3547_vm6, %v3022_v31, %v3026_v30 }
 0x1e1   : > { %vm3192_vm11 = vmand %vm381_vm2, %vm386_vm5  ;;  %vm3551_vm2 = vcmp.ne.s32.totalorder %v2071_v15, 0 }
 0x1e2   : > { %v3546_v37 = vsel %vm3192_vm11, 4294967295, %v3545_v37  ;;  %vm3548_vm10 = vmmov %vm3547_vm6 }
 0x1e3   : > { %v1123_v12 = vsel %vm3548_vm10, %v3041_v9, %v1107_v55  ;;  %vm3206_vm4 = vmand %vm383_vm3, %vm386_vm5  ;;  %vm3557_vm10 = vnez %v3527_v8 }
 0x1e4   : > { %1150 = vrot.lane.b32.xlu1 %v1129_v2, %s2325_s29  ;;  %v1131_v18 = vsel %vm3551_vm2, %v1123_v12, %v1115_v1  ;;  %vm3552_vm11 = vmmov %vm3551_vm2 }
 0x1e5   : > { %v1133_v7 = vsel %vm3552_vm11, %v3012_v27, %v3018_v45  ;;  %vm3553_vm6 = vmmov %vm3551_vm2  ;;  %vm3556_vm11 = vnez %v3525_v40 }
 0x1e6   : > { %v1135_v14 = vsel %vm3553_vm6, %v1111_v59, %v1119_v21  ;;  %vm3554_vm5 = vmmov %vm3551_vm2  ;;  %vm3559_vm6 = vnez %v3531_v36 }
 0x1e7   : > { %v1137_v27 = vsel %vm3554_vm5, %v1113_v19, %v1121_v42  ;;  %vm3555_vm3 = vmmov %vm3551_vm2  ;;  %vm3558_vm2 = vnez %v3529_v28  ;;  %vm3560_vm5 = vnez %v3535_v44 }
 0x1e8   : > { %1154 = vrot.lane.b32.xlu1 %v1131_v18, %s2325_s29  ;;  %v1139_v10 = vsel %vm3555_vm3, %v1115_v1, %v1123_v12  ;;  %vm3561_vm3 = vnez %v3546_v37 }
 0x1ec   : > { %1158 = vrot.lane.b32.xlu1 %v1133_v7, %s2325_s29 }
 0x1f0   : > { %1162 = vrot.lane.b32.xlu1 %v1135_v14, %s2325_s29  ;;  %v628_v51 = vpop.permute.xlu0 %627 }
 0x1f1   : > { %v659_v58 = vsel %vm3045_vm8, %v628_v51, 0.0 }
 0x1f2   : > { %675 = vst [vmem:[%s3225_s10] sm:$0xff] %v659_v58 }
 0x1f4   : > { %1166 = vrot.lane.b32.xlu1 %v1137_v27, %s2325_s29  ;;  %v630_v45 = vpop.permute.xlu1 %629  ;;  %v644_v31 = vpop.permute.xlu0 %643 }
 0x1f5   : > { %v660_v30 = vsel %vm3051_vm12, %v630_v45, 0.0  ;;  %v667_v24 = vsel %vm3060_vm14, %v644_v31, 0.0 }
 0x1f6   : > { %676 = vst [vmem:[%s3225_s10 + $0x8] sm:$0xff] %v660_v30  ;;  %683 = vst [vmem:[%s3225_s10 + $0x40] sm:$0xff] %v667_v24 }
 0x1f8   : > { %1170 = vrot.lane.b32.xlu1 %v1139_v10, %s2325_s29  ;;  %v632_v61 = vpop.permute.xlu1 %631  ;;  %v648_v49 = vpop.permute.xlu0 %647 }
 0x1f9   : > { %v661_v11 = vsel %vm3072_vm15, %v632_v61, 0.0  ;;  %v669_v47 = vsel %vm3086_vm1, %v648_v49, 0.0 }
 0x1fa   : > { %677 = vst [vmem:[%s3225_s10 + $0x10] sm:$0xff] %v661_v11  ;;  %685 = vst [vmem:[%s3225_s10 + $0x50] sm:$0xff] %v669_v47 }
 0x1fc   : > { %v634_v23 = vpop.permute.xlu1 %633  ;;  %v652_v57 = vpop.permute.xlu0 %651 }
 0x1fd   : > { %v662_v15 = vsel %vm3095_vm7, %v634_v23, 0.0  ;;  %v671_v9 = vsel %vm3556_vm11, %v652_v57, 0.0 }
 0x1fe   : > { %678 = vst [vmem:[%s3225_s10 + $0x18] sm:$0xff] %v662_v15  ;;  %687 = vst [vmem:[%s3225_s10 + $0x60] sm:$0xff] %v671_v9 }
 0x200   : > { %v636_v52 = vpop.permute.xlu1 %635  ;;  %v656_v16 = vpop.permute.xlu0 %655 }
 0x201   : > { %v663_v54 = vsel %vm3557_vm10, %v636_v52, 0.0  ;;  %v673_v13 = vsel %vm3558_vm2, %v656_v16, 0.0 }
 0x202   : > { %679 = vst [vmem:[%s3225_s10 + $0x20] sm:$0xff] %v663_v54  ;;  %689 = vst [vmem:[%s3225_s10 + $0x70] sm:$0xff] %v673_v13 }
 0x204   : > { %v638_v29 = vpop.permute.xlu1 %637 }
 0x205   : > { %v664_v63 = vsel %vm3559_vm6, %v638_v29, 0.0 }
 0x206   : > { %680 = vst [vmem:[%s3225_s10 + $0x28] sm:$0xff] %v664_v63 }
 0x211   : > { %v640_v32 = vpop.permute.xlu1 %639 }
 0x212   : > { %v665_v33 = vsel %vm3560_vm5, %v640_v32, 0.0  ;;  %v884_v0 = vpop.permute.xlu0 %883 }
 0x213   : > { %681 = vst [vmem:[%s3225_s10 + $0x30] sm:$0xff] %v665_v33  ;;  %v915_v50 = vsel %vm3045_vm8, %v884_v0, 0.0 }
 0x214   : > { %1363 = vst [vmem:[%s3225_s10 + $0x80] sm:$0xff] %v915_v50 }
 0x215   : > { %v642_v55 = vpop.permute.xlu1 %641 }
 0x216   : > { %v666_v43 = vsel %vm3172_vm13, %v642_v55, 0.0  ;;  %v888_v53 = vpop.permute.xlu0 %887 }
 0x217   : > { %682 = vst [vmem:[%s3225_s10 + $0x38] sm:$0xff] %v666_v43  ;;  %v917_v17 = vsel %vm3072_vm15, %v888_v53, 0.0 }
 0x218   : > { %1365 = vst [vmem:[%s3225_s10 + $0x90] sm:$0xff] %v917_v17 }
 0x219   : > { %v646_v48 = vpop.permute.xlu1 %645 }
 0x21a   : > { %v668_v22 = vsel %vm3178_vm0, %v646_v48, 0.0  ;;  %v892_v62 = vpop.permute.xlu0 %891 }
 0x21b   : > { %684 = vst [vmem:[%s3225_s10 + $0x48] sm:$0xff] %v668_v22  ;;  %v919_v38 = vsel %vm3557_vm10, %v892_v62, 0.0 }
 0x21c   : > { %1367 = vst [vmem:[%s3225_s10 + $0xa0] sm:$0xff] %v919_v38 }
 0x21d   : > { %v650_v59 = vpop.permute.xlu1 %649 }
 0x21e   : > { %v670_v21 = vsel %vm3184_vm9, %v650_v59, 0.0  ;;  %v896_v35 = vpop.permute.xlu0 %895 }
 0x21f   : > { %686 = vst [vmem:[%s3225_s10 + $0x58] sm:$0xff] %v670_v21  ;;  %v921_v4 = vsel %vm3560_vm5, %v896_v35, 0.0 }
 0x220   : > { %1369 = vst [vmem:[%s3225_s10 + $0xb0] sm:$0xff] %v921_v4 }
 0x221   : > { %v654_v3 = vpop.permute.xlu1 %653 }
 0x222   : > { %v672_v6 = vsel %vm3561_vm3, %v654_v3, 0.0  ;;  %v900_v19 = vpop.permute.xlu0 %899 }
 0x223   : > { %688 = vst [vmem:[%s3225_s10 + $0x68] sm:$0xff] %v672_v6  ;;  %v923_v42 = vsel %vm3060_vm14, %v900_v19, 0.0 }
 0x224   : > { %1371 = vst [vmem:[%s3225_s10 + $0xc0] sm:$0xff] %v923_v42 }
 0x225   : > { %v658_v2 = vpop.permute.xlu1 %657 }
 0x226   : > { %v674_v1 = vsel %vm3206_vm4, %v658_v2, 0.0  ;;  %v904_v12 = vpop.permute.xlu0 %903 }
 0x227   : > { %690 = vst [vmem:[%s3225_s10 + $0x78] sm:$0xff] %v674_v1  ;;  %v925_v18 = vsel %vm3086_vm1, %v904_v12, 0.0 }
 0x228   : > { %1373 = vst [vmem:[%s3225_s10 + $0xd0] sm:$0xff] %v925_v18 }
 0x229   : > { %v886_v7 = vpop.permute.xlu1 %885 }
 0x22a   : > { %v916_v14 = vsel %vm3051_vm12, %v886_v7, 0.0  ;;  %v908_v51 = vpop.permute.xlu0 %907 }
 0x22b   : > { %1364 = vst [vmem:[%s3225_s10 + $0x88] sm:$0xff] %v916_v14  ;;  %v927_v58 = vsel %vm3556_vm11, %v908_v51, 0.0 }
 0x22c   : > { %1375 = vst [vmem:[%s3225_s10 + $0xe0] sm:$0xff] %v927_v58 }
 0x22d   : > { %v890_v27 = vpop.permute.xlu1 %889 }
 0x22e   : > { %v918_v45 = vsel %vm3095_vm7, %v890_v27, 0.0  ;;  %v912_v31 = vpop.permute.xlu0 %911 }
 0x22f   : > { %1366 = vst [vmem:[%s3225_s10 + $0x98] sm:$0xff] %v918_v45  ;;  %v929_v30 = vsel %vm3558_vm2, %v912_v31, 0.0 }
 0x230   : > { %1377 = vst [vmem:[%s3225_s10 + $0xf0] sm:$0xff] %v929_v30 }
 0x236   : > { %v1141_v24 = vpop.permute.xlu0 %1140  ;;  %v894_v10 = vpop.permute.xlu1 %893 }
 0x237   : > { %v1172_v61 = vsel %vm3045_vm8, %v1141_v24, 0.0  ;;  %v920_v49 = vsel %vm3559_vm6, %v894_v10, 0.0 }
 0x238   : > { %1395 = vst [vmem:[%s3225_s10 + $0x100] sm:$0xff] %v1172_v61  ;;  %1368 = vst [vmem:[%s3225_s10 + $0xa8] sm:$0xff] %v920_v49 }
 0x23a   : > { %v1145_v11 = vpop.permute.xlu0 %1144  ;;  %v898_v47 = vpop.permute.xlu1 %897 }
 0x23b   : > { %v1174_v23 = vsel %vm3072_vm15, %v1145_v11, 0.0  ;;  %v922_v57 = vsel %vm3172_vm13, %v898_v47, 0.0 }
 0x23c   : > { %1397 = vst [vmem:[%s3225_s10 + $0x110] sm:$0xff] %v1174_v23  ;;  %1370 = vst [vmem:[%s3225_s10 + $0xb8] sm:$0xff] %v922_v57 }
 0x23e   : > { %v1149_v20 = vpop.permute.xlu0 %1148  ;;  %v902_v15 = vpop.permute.xlu1 %901 }
 0x23f   : > { %v1176_v9 = vsel %vm3557_vm10, %v1149_v20, 0.0  ;;  %v924_v52 = vsel %vm3178_vm0, %v902_v15, 0.0 }
 0x240   : > { %1399 = vst [vmem:[%s3225_s10 + $0x120] sm:$0xff] %v1176_v9  ;;  %1372 = vst [vmem:[%s3225_s10 + $0xc8] sm:$0xff] %v924_v52 }
 0x242   : > { %v1153_v41 = vpop.permute.xlu0 %1152  ;;  %v906_v16 = vpop.permute.xlu1 %905 }
 0x243   : > { %v1178_v54 = vsel %vm3560_vm5, %v1153_v41, 0.0  ;;  %v926_v13 = vsel %vm3184_vm9, %v906_v16, 0.0 }
 0x244   : > { %1401 = vst [vmem:[%s3225_s10 + $0x130] sm:$0xff] %v1178_v54  ;;  %1374 = vst [vmem:[%s3225_s10 + $0xd8] sm:$0xff] %v926_v13 }
 0x246   : > { %v1157_v8 = vpop.permute.xlu0 %1156  ;;  %v910_v29 = vpop.permute.xlu1 %909 }
 0x247   : > { %v1180_v63 = vsel %vm3060_vm14, %v1157_v8, 0.0  ;;  %v928_v32 = vsel %vm3561_vm3, %v910_v29, 0.0 }
 0x248   : > { %1403 = vst [vmem:[%s3225_s10 + $0x140] sm:$0xff] %v1180_v63  ;;  %1376 = vst [vmem:[%s3225_s10 + $0xe8] sm:$0xff] %v928_v32 }
 0x24a   : > { %v1161_v44 = vpop.permute.xlu0 %1160  ;;  %v914_v33 = vpop.permute.xlu1 %913 }
 0x24b   : > { %v1182_v0 = vsel %vm3086_vm1, %v1161_v44, 0.0  ;;  %v930_v50 = vsel %vm3206_vm4, %v914_v33, 0.0 }
 0x24c   : > { %1405 = vst [vmem:[%s3225_s10 + $0x150] sm:$0xff] %v1182_v0  ;;  %1378 = vst [vmem:[%s3225_s10 + $0xf8] sm:$0xff] %v930_v50 }
 0x24e   : > { %v1165_v34 = vpop.permute.xlu0 %1164  ;;  %v1143_v55 = vpop.permute.xlu1 %1142 }
 0x24f   : > { %v1184_v43 = vsel %vm3556_vm11, %v1165_v34, 0.0  ;;  %v1173_v53 = vsel %vm3051_vm12, %v1143_v55, 0.0 }
 0x250   : > { %1407 = vst [vmem:[%s3225_s10 + $0x160] sm:$0xff] %v1184_v43  ;;  %1396 = vst [vmem:[%s3225_s10 + $0x108] sm:$0xff] %v1173_v53 }
 0x252   : > { %v1169_v26 = vpop.permute.xlu0 %1168  ;;  %v1147_v17 = vpop.permute.xlu1 %1146 }
 0x253   : > { %v1186_v48 = vsel %vm3558_vm2, %v1169_v26, 0.0  ;;  %v1175_v22 = vsel %vm3095_vm7, %v1147_v17, 0.0 }
 0x254   : > { %1409 = vst [vmem:[%s3225_s10 + $0x170] sm:$0xff] %v1186_v48  ;;  %1398 = vst [vmem:[%s3225_s10 + $0x118] sm:$0xff] %v1175_v22 }
 0x256   : > { %v1151_v40 = vpop.permute.xlu1 %1150 }
 0x257   : > { %v1177_v60 = vsel %vm3559_vm6, %v1151_v40, 0.0 }
 0x258   : > { %1400 = vst [vmem:[%s3225_s10 + $0x128] sm:$0xff] %v1177_v60 }
 0x25a   : > { %v1155_v62 = vpop.permute.xlu1 %1154 }
 0x25b   : > { %v1179_v38 = vsel %vm3172_vm13, %v1155_v62, 0.0 }
 0x25c   : > { %1402 = vst [vmem:[%s3225_s10 + $0x138] sm:$0xff] %v1179_v38 }
 0x25e   : > { %v1159_v28 = vpop.permute.xlu1 %1158 }
 0x25f   : > { %v1181_v56 = vsel %vm3178_vm0, %v1159_v28, 0.0 }
 0x260   : > { %1404 = vst [vmem:[%s3225_s10 + $0x148] sm:$0xff] %v1181_v56 }
 0x262   : > { %v1163_v59 = vpop.permute.xlu1 %1162 }
 0x263   : > { %v1183_v36 = vsel %vm3184_vm9, %v1163_v59, 0.0 }
 0x264   : > { %1406 = vst [vmem:[%s3225_s10 + $0x158] sm:$0xff] %v1183_v36 }
 0x266   : > { %v1167_v21 = vpop.permute.xlu1 %1166 }
 0x267   : > { %v1185_v25 = vsel %vm3561_vm3, %v1167_v21, 0.0 }
 0x268   : > { %1408 = vst [vmem:[%s3225_s10 + $0x168] sm:$0xff] %v1185_v25 }
 0x26a   : > { %v1171_v39 = vpop.permute.xlu1 %1170 }
 0x26b   : > { %v1187_v5 = vsel %vm3206_vm4, %v1171_v39, 0.0 }
 0x26c   : > { %1410 = vst [vmem:[%s3225_s10 + $0x178] sm:$0xff] %v1187_v5 }
 0x26d   : > { %1567 = shalt.err (!%p1564_p2)
}
 0x26e   : > { %s1568_s19 = scalar_lea.hbm %s3377_s0, 6144  ;;  %s1572_s21 = scalar_lea.hbm %s3428_s5, 12288 }
 0x26f   : > { %p1569_p3 = scmp.ne.s32.totalorder %s3377_s0, %s1568_s19  ;;  %p1573_p4 = scmp.lt.u32.totalorder %s3377_s0, %s3428_s5 }
 0x270   : > { %p1574_p6 = scmp.lt.u32.totalorder %s1572_s21, %s1568_s19  ;;  %p1576_p9 = scmp.lt.u32.totalorder %s1568_s19, %s3377_s0 }
 0x271   : > { %p1570_p12 = pnand %p1569_p3, %p3562_p11 }
 0x272   : > { %p1575_p8 = por %p1574_p6, %p1573_p4 }
 0x273   : > { %p1571_p0 = pneg %p1570_p12 }
 0x274   : > { %p1577_p13 = por %p1576_p9, %p1575_p8 }
 0x276   : > { %p1578_p5 = pnand %p1577_p13, %p1571_p0 }
 0x278   : > { %1581 = shalt.err (!%p1578_p5)
}
 0x279   : > { %s1632_s28 = smov 128   ;;  %s1633_s29 = smov 8  }
 0x27a   : > { %1426 = dma.vmem_to_hbm [thread:$0]  (%p3562_p11), %s3379_s11, 6144, %s3377_s0, %s1206_s18, %s1632_s28, %s1632_s28, %s1633_s29  }
 0x27b PF: > { %s1234_s9 = sand.u32 1, %s1610_s3   ;;  %p3563_p7 = scmp.ne.s32.totalorder %s3457_s26, 0 }
 0x27c   : > { %p3564_p10 = scmp.ge.s32.totalorder %s1622_s17, 2  ;;  %s1235_s10 = scalar_lea.sflag [#allocation9], %s1234_s9 }
 0x27e   : > { %p1433_p1 = pnand %p3564_p10, %p3563_p7 }
 0x280   : > { %1605 = dma.done.wait (!%p1433_p1), %s1235_s10, 6144  }
 0x281   : > { %1607 = vsyncadd (!%p1433_p1), %s1235_s10, 4294961152  ;;  %p34_p2 = scmp.ge.s32.totalorder %s1710_s20, 4   ;;  %s3565_s3 = smov %s1614_s15 }
 0x282   : > { %s3566_s15 = smov %s1618_s16  ;;  %s3567_s16 = smov %s1722_s23 }
 0x283   : > { %s3568_s17 = smov %s1710_s20  ;;  %36 = sbr.rel (!%p34_p2) target bundleno = 48 (0x30), region = 73 }
 0x28a   :  { %1240 = vsyncpa [#allocation8], 1 }
 0x28b   :  { %1242 = vsyncpa [#allocation8 + $0x1], 1 }
 0x28c   :  { %1243 = vsyncpa [#allocation9], 1 }
 0x28d   :  { %1245 = vsyncpa [#allocation9 + $0x1], 1 }

</bundles_post_ra>
